<compile_context>
chip_gen: v6e
topology: v6e:2x2x1
jax: 0.10.0
libtpu: 0.0.40
codegen_flags: <defaults>
</compile_context>

<pallas_src>
import jax
import jax.numpy as jnp
from jax import lax
from jax.experimental import pallas as pl
from jax.experimental.pallas import tpu as pltpu


# ----------------------------------------------------------------------------
# Pallas kernel: multi-layer LSTM recurrence + final Linear.
# ----------------------------------------------------------------------------
def _make_lstm_fc_kernel(num_layers, seq_len, hidden_dim):
    H = hidden_dim
    T = seq_len

    def kernel(x_ref, w_ih0_ref, w_hh0_ref, b0_ref, *refs):
        # refs layout:
        #   [W_1, b_1, ..., W_{L-1}, b_{L-1}, fc_w, fc_b, out_ref, xproj_ref]
        n_deep = num_layers - 1
        deep_refs = refs[: 2 * n_deep]
        fc_w_ref, fc_b_ref, out_ref, xproj_ref = refs[2 * n_deep:]

        Bp = out_ref.shape[0]

        # ---- Layer-0 input projection for ALL timesteps in one MXU call, ----
        # ---- bias folded in.  Stored to a [T, Bp, 4H] f32 VMEM scratch.  ----
        xproj_ref[...] = (
            jnp.dot(x_ref[...], w_ih0_ref[...],
                    preferred_element_type=jnp.float32)
            + b0_ref[...]
        ).reshape(T, Bp, 4 * H)

        # Hoist weight loads and bias broadcasts out of the time loop.
        w_hh0 = w_hh0_ref[...]                                      # [H, 4H] bf16
        Ws = [deep_refs[2 * j][...] for j in range(n_deep)]         # [2H, 4H] bf16
        bs = [jnp.broadcast_to(deep_refs[2 * j + 1][...], (Bp, 4 * H))
              for j in range(n_deep)]                               # [Bp, 4H] f32

        def gate_act(gates, c_prev):
            # gate column order (after param-prep permutation): i, f, o, g
            ifo = jax.nn.sigmoid(gates[:, : 3 * H])
            g = jnp.tanh(gates[:, 3 * H:])
            i = ifo[:, :H]
            f = ifo[:, H: 2 * H]
            o = ifo[:, 2 * H: 3 * H]
            c = f * c_prev + i * g
            h = o * jnp.tanh(c)
            return h, c

        def step(t, carry):
            hs, cs = carry                                  # tuples of [Bp, H] f32
            new_hs, new_cs = [], []

            # Layer 0: input part precomputed; only the recurrent matmul left.
            g0 = xproj_ref[t] + jnp.dot(
                hs[0].astype(w_hh0.dtype), w_hh0,
                preferred_element_type=jnp.float32)
            h, c = gate_act(g0, cs[0])
            new_hs.append(h)
            new_cs.append(c)

            # Deeper layers: single fused matmul  [inp ; h] @ [W_ih ; W_hh].
            inp = h
            for j in range(n_deep):
                l = j + 1
                xh = jnp.concatenate([inp, hs[l]], axis=-1).astype(Ws[j].dtype)
                gl = jnp.dot(xh, Ws[j],
                             preferred_element_type=jnp.float32) + bs[j]
                h, c = gate_act(gl, cs[l])
                new_hs.append(h)
                new_cs.append(c)
                inp = h
            return tuple(new_hs), tuple(new_cs)

        init_h = tuple(jnp.zeros((Bp, H), jnp.float32) for _ in range(num_layers))
        init_c = tuple(jnp.zeros((Bp, H), jnp.float32) for _ in range(num_layers))
        # Fully unrolled: T is small & static; gives the scheduler visibility
        # across step boundaries.
        hs, _ = lax.fori_loop(0, T, step, (init_h, init_c), unroll=True)

        # fc(hidden[-1])
        out_ref[...] = (
            jnp.dot(hs[-1].astype(fc_w_ref.dtype), fc_w_ref[...],
                    preferred_element_type=jnp.float32)
            + fc_b_ref[...]
        )

    return kernel


# ----------------------------------------------------------------------------
# Parameter prep: gate-column permutation, layer fusion, bf16 casts.
# ----------------------------------------------------------------------------
def _permute_gate_cols(w):
    """torch gate order (i,f,g,o) -> kernel order (i,f,o,g) along last axis."""
    i, f, g, o = jnp.split(w, 4, axis=-1)
    return jnp.concatenate([i, f, o, g], axis=-1)


def _prep_kernel_params(params, compute_dtype=jnp.bfloat16):
    layer_ps = params["lstm"]

    # Layer 0: keep w_ih / w_hh separate (input projection hoisted out of loop).
    l0 = layer_ps[0]
    w_ih0 = _permute_gate_cols(l0["w_ih"]).astype(compute_dtype)     # [E, 4H]
    w_hh0 = _permute_gate_cols(l0["w_hh"]).astype(compute_dtype)     # [H, 4H]
    b0 = _permute_gate_cols(l0["b"]).astype(jnp.float32)             # [1, 4H]

    deep = []
    for lp in layer_ps[1:]:
        w = jnp.concatenate(
            [_permute_gate_cols(lp["w_ih"]), _permute_gate_cols(lp["w_hh"])],
            axis=0).astype(compute_dtype)                            # [2H, 4H]
        b = _permute_gate_cols(lp["b"]).astype(jnp.float32)          # [1, 4H]
        deep.append((w, b))

    fc_w = params["fc_w"].astype(compute_dtype)
    fc_b = params["fc_b"].astype(jnp.float32)
    return w_ih0, w_hh0, b0, deep, fc_w, fc_b


# ----------------------------------------------------------------------------
# Wrapper: time-major embedding gather (glue), batch padding, pallas_call.
# ----------------------------------------------------------------------------
def caption_lstm_forward(tokens, params, compute_dtype=jnp.bfloat16):
    """tokens: int32 [B, T].  Returns float32 [B, 256]."""
    emb_table = params["embedding"]               # [V, E]
    num_layers = len(params["lstm"])
    B, T = tokens.shape
    H = params["lstm"][0]["w_hh"].shape[0]
    out_dim = params["fc_w"].shape[1]

    w_ih0, w_hh0, b0, deep, fc_w, fc_b = _prep_kernel_params(params, compute_dtype)

    # Pad batch to a full sublane group (8): full vregs for every gate op.
    Bp = max(8, ((B + 7) // 8) * 8)

    # Embedding gather, directly time-major (no materialized [B,T,E] transpose).
    # TODO(synk): at production vocab/H/T, gather in-kernel via scalar-prefetched
    # token ids and stream the time axis with a grid (v7x has only 64 MiB VMEM).
    x_tbe = jnp.take(emb_table, tokens.T, axis=0)              # [T, B, E]
    x_tbe = jnp.pad(x_tbe, ((0, 0), (0, Bp - B), (0, 0)))      # [T, Bp, E]
    x_flat = x_tbe.reshape(T * Bp, -1).astype(compute_dtype)   # [T*Bp, E]

    kernel = _make_lstm_fc_kernel(num_layers, T, H)

    operands = [x_flat, w_ih0, w_hh0, b0]
    for w, b in deep:
        operands += [w, b]
    operands += [fc_w, fc_b]

    vmem_spec = pl.BlockSpec(memory_space=pltpu.MemorySpace.VMEM)
    out = pl.pallas_call(
        kernel,
        out_shape=jax.ShapeDtypeStruct((Bp, out_dim), jnp.float32),
        in_specs=[vmem_spec] * len(operands),
        out_specs=vmem_spec,
        scratch_shapes=[pltpu.VMEM((T, Bp, 4 * H), jnp.float32)],
        compiler_params=pltpu.CompilerParams(
            vmem_limit_bytes=32 * 1024 * 1024),
    )(*operands)
    return out[:B]


# ----------------------------------------------------------------------------
# Deterministic parameter init (shapes follow nn.Embedding / nn.LSTM / nn.Linear).
# ----------------------------------------------------------------------------
def init_params(key, vocab_size, embed_dim, hidden_dim, num_layers, out_dim=256):
    keys = jax.random.split(key, 2 + 4 * num_layers + 2)
    k = iter(keys)
    scale = 1.0 / jnp.sqrt(hidden_dim)

    params = {}
    params["embedding"] = jax.random.normal(
        next(k), (vocab_size, embed_dim), jnp.float32
    )

    layers = []
    for l in range(num_layers):
        in_dim = embed_dim if l == 0 else hidden_dim
        # torch stores weight_ih as [4H, in]; we pre-transpose to [in, 4H].
        w_ih = jax.random.uniform(next(k), (in_dim, 4 * hidden_dim),
                                  jnp.float32, -scale, scale)
        w_hh = jax.random.uniform(next(k), (hidden_dim, 4 * hidden_dim),
                                  jnp.float32, -scale, scale)
        b_ih = jax.random.uniform(next(k), (4 * hidden_dim,),
                                  jnp.float32, -scale, scale)
        b_hh = jax.random.uniform(next(k), (4 * hidden_dim,),
                                  jnp.float32, -scale, scale)
        layers.append({
            "w_ih": w_ih,
            "w_hh": w_hh,
            "b": (b_ih + b_hh).reshape(1, 4 * hidden_dim),
        })
    params["lstm"] = layers

    params["fc_w"] = jax.random.uniform(next(k), (hidden_dim, out_dim),
                                        jnp.float32, -scale, scale)
    params["fc_b"] = jax.random.uniform(next(k), (1, out_dim),
                                        jnp.float32, -scale, scale)
    return params


# ----------------------------------------------------------------------------
# Pure-JAX f32 reference (mirrors torch.nn.LSTM semantics) for verification.
# ----------------------------------------------------------------------------
def reference_forward(tokens, params):
    x = jnp.take(params["embedding"], tokens, axis=0)   # [B, T, E]
    B, T, _ = x.shape
    H = params["lstm"][0]["w_hh"].shape[0]
    layer_in = x
    h_last = None
    for lp in params["lstm"]:
        h = jnp.zeros((B, H), jnp.float32)
        c = jnp.zeros((B, H), jnp.float32)
        outs = []
        for t in range(T):
            gates = layer_in[:, t, :] @ lp["w_ih"] + h @ lp["w_hh"] + lp["b"]
            i = jax.nn.sigmoid(gates[:, 0:H])
            f = jax.nn.sigmoid(gates[:, H:2 * H])
            g = jnp.tanh(gates[:, 2 * H:3 * H])
            o = jax.nn.sigmoid(gates[:, 3 * H:4 * H])
            c = f * c + i * g
            h = o * jnp.tanh(c)
            outs.append(h)
        layer_in = jnp.stack(outs, axis=1)
        h_last = h
    return h_last @ params["fc_w"] + params["fc_b"]


if __name__ == "__main__":
    # Small shapes consistent with CaptionLSTM(vocab_size, embed_dim, hidden_dim, num_layers)
    VOCAB, EMBED, HIDDEN, LAYERS = 50, 32, 32, 2
    B, T = 2, 8

    key = jax.random.PRNGKey(0)
    k_tok, k_par = jax.random.split(key)
    tokens = jax.random.randint(k_tok, (B, T), 0, VOCAB, dtype=jnp.int32)
    params = init_params(k_par, VOCAB, EMBED, HIDDEN, LAYERS)

    out = caption_lstm_forward(tokens, params)
    out = jax.block_until_ready(out)

    ref = reference_forward(tokens, params)
    assert out.shape == (B, 256), out.shape
    err = float(jnp.max(jnp.abs(out - ref)))
    # bf16 matmuls (f32 accumulation) vs. the pure-f32 reference.
    assert err < 5e-2, err
    print("KERNEL_OK")
</pallas_src>

<mosaic_0001>
module attributes {stable_mosaic.version = 11 : i64} {
  func.func @kernel(%arg0: memref<64x32xbf16, #tpu.memory_space<vmem>>, %arg1: memref<32x128xbf16, #tpu.memory_space<vmem>>, %arg2: memref<32x128xbf16, #tpu.memory_space<vmem>>, %arg3: memref<1x128xf32, #tpu.memory_space<vmem>>, %arg4: memref<64x128xbf16, #tpu.memory_space<vmem>>, %arg5: memref<1x128xf32, #tpu.memory_space<vmem>>, %arg6: memref<32x256xbf16, #tpu.memory_space<vmem>>, %arg7: memref<1x256xf32, #tpu.memory_space<vmem>>, %arg8: memref<8x256xf32, #tpu.memory_space<vmem>>, %arg9: memref<8x8x128xf32, #tpu.memory_space<vmem>>) attributes {dimension_semantics = [], scalar_prefetch = 0 : i64, scratch_operands = 1 : i64, tpu.core_type = #tpu.core_type<tc>} {
    %c0 = arith.constant 0 : index
    %c0_0 = arith.constant 0 : index
    %0 = vector.load %arg0[%c0, %c0_0] : memref<64x32xbf16, #tpu.memory_space<vmem>>, vector<64x32xbf16>
    %c0_1 = arith.constant 0 : index
    %c0_2 = arith.constant 0 : index
    %1 = vector.load %arg1[%c0_1, %c0_2] : memref<32x128xbf16, #tpu.memory_space<vmem>>, vector<32x128xbf16>
    %cst = arith.constant dense<0.000000e+00> : vector<64x128xf32>
    %2 = tpu.matmul %0, %1, %cst {dimension_numbers = #tpu.dot_dimension_numbers<[1], [0], [0], [1], [0, 0, 1, 1], [], []>} : vector<64x32xbf16>, vector<32x128xbf16>, vector<64x128xf32> -> vector<64x128xf32>
    %c0_3 = arith.constant 0 : index
    %c0_4 = arith.constant 0 : index
    %3 = vector.load %arg3[%c0_3, %c0_4] : memref<1x128xf32, #tpu.memory_space<vmem>>, vector<1x128xf32>
    %4 = vector.broadcast %3 : vector<1x128xf32> to vector<64x128xf32>
    %5 = arith.addf %2, %4 : vector<64x128xf32>
    %6 = vector.shape_cast %5 : vector<64x128xf32> to vector<8x8x128xf32>
    %c0_5 = arith.constant 0 : index
    %c0_6 = arith.constant 0 : index
    %c0_7 = arith.constant 0 : index
    %7 = vector.load %arg9[%c0_5, %c0_6, %c0_7] : memref<8x8x128xf32, #tpu.memory_space<vmem>>, vector<8x8x128xf32>
    tpu.vector_store %arg9[%c0_5, %c0_6, %c0_7], %6 {strides = array<i32>} : memref<8x8x128xf32, #tpu.memory_space<vmem>>, vector<8x8x128xf32>,
    %c0_8 = arith.constant 0 : index
    %c0_9 = arith.constant 0 : index
    %8 = vector.load %arg2[%c0_8, %c0_9] : memref<32x128xbf16, #tpu.memory_space<vmem>>, vector<32x128xbf16>
    %c0_10 = arith.constant 0 : index
    %c0_11 = arith.constant 0 : index
    %9 = vector.load %arg4[%c0_10, %c0_11] : memref<64x128xbf16, #tpu.memory_space<vmem>>, vector<64x128xbf16>
    %c0_12 = arith.constant 0 : index
    %c0_13 = arith.constant 0 : index
    %10 = vector.load %arg5[%c0_12, %c0_13] : memref<1x128xf32, #tpu.memory_space<vmem>>, vector<1x128xf32>
    %11 = vector.shape_cast %10 : vector<1x128xf32> to vector<1x128xf32>
    %12 = vector.broadcast %11 : vector<1x128xf32> to vector<8x128xf32>
    %cst_14 = arith.constant 0.000000e+00 : f32
    %13 = vector.broadcast %cst_14 : f32 to vector<8x32xf32>
    %cst_15 = arith.constant 0.000000e+00 : f32
    %14 = vector.broadcast %cst_15 : f32 to vector<8x32xf32>
    %cst_16 = arith.constant 0.000000e+00 : f32
    %15 = vector.broadcast %cst_16 : f32 to vector<8x32xf32>
    %cst_17 = arith.constant 0.000000e+00 : f32
    %16 = vector.broadcast %cst_17 : f32 to vector<8x32xf32>
    %c0_i32 = arith.constant 0 : i32
    %17 = arith.index_cast %c0_i32 : i32 to index
    %c0_18 = arith.constant 0 : index
    %c0_19 = arith.constant 0 : index
    %18 = vector.load %arg9[%17, %c0_18, %c0_19] : memref<8x8x128xf32, #tpu.memory_space<vmem>>, vector<1x8x128xf32>
    %19 = vector.shape_cast %18 : vector<1x8x128xf32> to vector<8x128xf32>
    %20 = arith.truncf %13 : vector<8x32xf32> to vector<8x32xbf16>
    %cst_20 = arith.constant dense<0.000000e+00> : vector<8x128xf32>
    %21 = tpu.matmul %20, %8, %cst_20 {dimension_numbers = #tpu.dot_dimension_numbers<[1], [0], [0], [1], [0, 0, 1, 1], [], []>} : vector<8x32xbf16>, vector<32x128xbf16>, vector<8x128xf32> -> vector<8x128xf32>
    %22 = arith.addf %19, %21 : vector<8x128xf32>
    %23 = vector.extract_strided_slice %22 {offsets = [0, 0], sizes = [8, 96], strides = [1, 1]} : vector<8x128xf32> to vector<8x96xf32>
    %24 = arith.negf %23 : vector<8x96xf32>
    %25 = math.exp %24 : vector<8x96xf32>
    %cst_21 = arith.constant 1.000000e+00 : f32
    %26 = vector.broadcast %cst_21 : f32 to vector<8x96xf32>
    %27 = arith.addf %26, %25 : vector<8x96xf32>
    %28 = arith.divf %26, %27 : vector<8x96xf32>
    %29 = vector.extract_strided_slice %22 {offsets = [0, 96], sizes = [8, 32], strides = [1, 1]} : vector<8x128xf32> to vector<8x32xf32>
    %30 = math.tanh %29 : vector<8x32xf32>
    %31 = vector.extract_strided_slice %28 {offsets = [0, 0], sizes = [8, 32], strides = [1, 1]} : vector<8x96xf32> to vector<8x32xf32>
    %32 = vector.extract_strided_slice %28 {offsets = [0, 32], sizes = [8, 32], strides = [1, 1]} : vector<8x96xf32> to vector<8x32xf32>
    %33 = vector.extract_strided_slice %28 {offsets = [0, 64], sizes = [8, 32], strides = [1, 1]} : vector<8x96xf32> to vector<8x32xf32>
    %34 = arith.mulf %32, %15 : vector<8x32xf32>
    %35 = arith.mulf %31, %30 : vector<8x32xf32>
    %36 = arith.addf %34, %35 : vector<8x32xf32>
    %37 = math.tanh %36 : vector<8x32xf32>
    %38 = arith.mulf %33, %37 : vector<8x32xf32>
    %39 = tpu.concatenate %38, %14 in 1 : vector<8x32xf32>, vector<8x32xf32> -> vector<8x64xf32>
    %40 = arith.truncf %39 : vector<8x64xf32> to vector<8x64xbf16>
    %cst_22 = arith.constant dense<0.000000e+00> : vector<8x128xf32>
    %41 = tpu.matmul %40, %9, %cst_22 {dimension_numbers = #tpu.dot_dimension_numbers<[1], [0], [0], [1], [0, 0, 1, 1], [], []>} : vector<8x64xbf16>, vector<64x128xbf16>, vector<8x128xf32> -> vector<8x128xf32>
    %42 = arith.addf %41, %12 : vector<8x128xf32>
    %43 = vector.extract_strided_slice %42 {offsets = [0, 0], sizes = [8, 96], strides = [1, 1]} : vector<8x128xf32> to vector<8x96xf32>
    %44 = arith.negf %43 : vector<8x96xf32>
    %45 = math.exp %44 : vector<8x96xf32>
    %cst_23 = arith.constant 1.000000e+00 : f32
    %46 = vector.broadcast %cst_23 : f32 to vector<8x96xf32>
    %47 = arith.addf %46, %45 : vector<8x96xf32>
    %48 = arith.divf %46, %47 : vector<8x96xf32>
    %49 = vector.extract_strided_slice %42 {offsets = [0, 96], sizes = [8, 32], strides = [1, 1]} : vector<8x128xf32> to vector<8x32xf32>
    %50 = math.tanh %49 : vector<8x32xf32>
    %51 = vector.extract_strided_slice %48 {offsets = [0, 0], sizes = [8, 32], strides = [1, 1]} : vector<8x96xf32> to vector<8x32xf32>
    %52 = vector.extract_strided_slice %48 {offsets = [0, 32], sizes = [8, 32], strides = [1, 1]} : vector<8x96xf32> to vector<8x32xf32>
    %53 = vector.extract_strided_slice %48 {offsets = [0, 64], sizes = [8, 32], strides = [1, 1]} : vector<8x96xf32> to vector<8x32xf32>
    %54 = arith.mulf %52, %16 : vector<8x32xf32>
    %55 = arith.mulf %51, %50 : vector<8x32xf32>
    %56 = arith.addf %54, %55 : vector<8x32xf32>
    %57 = math.tanh %56 : vector<8x32xf32>
    %58 = arith.mulf %53, %57 : vector<8x32xf32>
    %c1_i32 = arith.constant 1 : i32
    %59 = arith.index_cast %c1_i32 : i32 to index
    %c0_24 = arith.constant 0 : index
    %c0_25 = arith.constant 0 : index
    %60 = vector.load %arg9[%59, %c0_24, %c0_25] : memref<8x8x128xf32, #tpu.memory_space<vmem>>, vector<1x8x128xf32>
    %61 = vector.shape_cast %60 : vector<1x8x128xf32> to vector<8x128xf32>
    %62 = arith.truncf %38 : vector<8x32xf32> to vector<8x32xbf16>
    %cst_26 = arith.constant dense<0.000000e+00> : vector<8x128xf32>
    %63 = tpu.matmul %62, %8, %cst_26 {dimension_numbers = #tpu.dot_dimension_numbers<[1], [0], [0], [1], [0, 0, 1, 1], [], []>} : vector<8x32xbf16>, vector<32x128xbf16>, vector<8x128xf32> -> vector<8x128xf32>
    %64 = arith.addf %61, %63 : vector<8x128xf32>
    %65 = vector.extract_strided_slice %64 {offsets = [0, 0], sizes = [8, 96], strides = [1, 1]} : vector<8x128xf32> to vector<8x96xf32>
    %66 = arith.negf %65 : vector<8x96xf32>
    %67 = math.exp %66 : vector<8x96xf32>
    %cst_27 = arith.constant 1.000000e+00 : f32
    %68 = vector.broadcast %cst_27 : f32 to vector<8x96xf32>
    %69 = arith.addf %68, %67 : vector<8x96xf32>
    %70 = arith.divf %68, %69 : vector<8x96xf32>
    %71 = vector.extract_strided_slice %64 {offsets = [0, 96], sizes = [8, 32], strides = [1, 1]} : vector<8x128xf32> to vector<8x32xf32>
    %72 = math.tanh %71 : vector<8x32xf32>
    %73 = vector.extract_strided_slice %70 {offsets = [0, 0], sizes = [8, 32], strides = [1, 1]} : vector<8x96xf32> to vector<8x32xf32>
    %74 = vector.extract_strided_slice %70 {offsets = [0, 32], sizes = [8, 32], strides = [1, 1]} : vector<8x96xf32> to vector<8x32xf32>
    %75 = vector.extract_strided_slice %70 {offsets = [0, 64], sizes = [8, 32], strides = [1, 1]} : vector<8x96xf32> to vector<8x32xf32>
    %76 = arith.mulf %74, %36 : vector<8x32xf32>
    %77 = arith.mulf %73, %72 : vector<8x32xf32>
    %78 = arith.addf %76, %77 : vector<8x32xf32>
    %79 = math.tanh %78 : vector<8x32xf32>
    %80 = arith.mulf %75, %79 : vector<8x32xf32>
    %81 = tpu.concatenate %80, %58 in 1 : vector<8x32xf32>, vector<8x32xf32> -> vector<8x64xf32>
    %82 = arith.truncf %81 : vector<8x64xf32> to vector<8x64xbf16>
    %cst_28 = arith.constant dense<0.000000e+00> : vector<8x128xf32>
    %83 = tpu.matmul %82, %9, %cst_28 {dimension_numbers = #tpu.dot_dimension_numbers<[1], [0], [0], [1], [0, 0, 1, 1], [], []>} : vector<8x64xbf16>, vector<64x128xbf16>, vector<8x128xf32> -> vector<8x128xf32>
    %84 = arith.addf %83, %12 : vector<8x128xf32>
    %85 = vector.extract_strided_slice %84 {offsets = [0, 0], sizes = [8, 96], strides = [1, 1]} : vector<8x128xf32> to vector<8x96xf32>
    %86 = arith.negf %85 : vector<8x96xf32>
    %87 = math.exp %86 : vector<8x96xf32>
    %cst_29 = arith.constant 1.000000e+00 : f32
    %88 = vector.broadcast %cst_29 : f32 to vector<8x96xf32>
    %89 = arith.addf %88, %87 : vector<8x96xf32>
    %90 = arith.divf %88, %89 : vector<8x96xf32>
    %91 = vector.extract_strided_slice %84 {offsets = [0, 96], sizes = [8, 32], strides = [1, 1]} : vector<8x128xf32> to vector<8x32xf32>
    %92 = math.tanh %91 : vector<8x32xf32>
    %93 = vector.extract_strided_slice %90 {offsets = [0, 0], sizes = [8, 32], strides = [1, 1]} : vector<8x96xf32> to vector<8x32xf32>
    %94 = vector.extract_strided_slice %90 {offsets = [0, 32], sizes = [8, 32], strides = [1, 1]} : vector<8x96xf32> to vector<8x32xf32>
    %95 = vector.extract_strided_slice %90 {offsets = [0, 64], sizes = [8, 32], strides = [1, 1]} : vector<8x96xf32> to vector<8x32xf32>
    %96 = arith.mulf %94, %56 : vector<8x32xf32>
    %97 = arith.mulf %93, %92 : vector<8x32xf32>
    %98 = arith.addf %96, %97 : vector<8x32xf32>
    %99 = math.tanh %98 : vector<8x32xf32>
    %100 = arith.mulf %95, %99 : vector<8x32xf32>
    %c2_i32 = arith.constant 2 : i32
    %101 = arith.index_cast %c2_i32 : i32 to index
    %c0_30 = arith.constant 0 : index
    %c0_31 = arith.constant 0 : index
    %102 = vector.load %arg9[%101, %c0_30, %c0_31] : memref<8x8x128xf32, #tpu.memory_space<vmem>>, vector<1x8x128xf32>
    %103 = vector.shape_cast %102 : vector<1x8x128xf32> to vector<8x128xf32>
    %104 = arith.truncf %80 : vector<8x32xf32> to vector<8x32xbf16>
    %cst_32 = arith.constant dense<0.000000e+00> : vector<8x128xf32>
    %105 = tpu.matmul %104, %8, %cst_32 {dimension_numbers = #tpu.dot_dimension_numbers<[1], [0], [0], [1], [0, 0, 1, 1], [], []>} : vector<8x32xbf16>, vector<32x128xbf16>, vector<8x128xf32> -> vector<8x128xf32>
    %106 = arith.addf %103, %105 : vector<8x128xf32>
    %107 = vector.extract_strided_slice %106 {offsets = [0, 0], sizes = [8, 96], strides = [1, 1]} : vector<8x128xf32> to vector<8x96xf32>
    %108 = arith.negf %107 : vector<8x96xf32>
    %109 = math.exp %108 : vector<8x96xf32>
    %cst_33 = arith.constant 1.000000e+00 : f32
    %110 = vector.broadcast %cst_33 : f32 to vector<8x96xf32>
    %111 = arith.addf %110, %109 : vector<8x96xf32>
    %112 = arith.divf %110, %111 : vector<8x96xf32>
    %113 = vector.extract_strided_slice %106 {offsets = [0, 96], sizes = [8, 32], strides = [1, 1]} : vector<8x128xf32> to vector<8x32xf32>
    %114 = math.tanh %113 : vector<8x32xf32>
    %115 = vector.extract_strided_slice %112 {offsets = [0, 0], sizes = [8, 32], strides = [1, 1]} : vector<8x96xf32> to vector<8x32xf32>
    %116 = vector.extract_strided_slice %112 {offsets = [0, 32], sizes = [8, 32], strides = [1, 1]} : vector<8x96xf32> to vector<8x32xf32>
    %117 = vector.extract_strided_slice %112 {offsets = [0, 64], sizes = [8, 32], strides = [1, 1]} : vector<8x96xf32> to vector<8x32xf32>
    %118 = arith.mulf %116, %78 : vector<8x32xf32>
    %119 = arith.mulf %115, %114 : vector<8x32xf32>
    %120 = arith.addf %118, %119 : vector<8x32xf32>
    %121 = math.tanh %120 : vector<8x32xf32>
    %122 = arith.mulf %117, %121 : vector<8x32xf32>
    %123 = tpu.concatenate %122, %100 in 1 : vector<8x32xf32>, vector<8x32xf32> -> vector<8x64xf32>
    %124 = arith.truncf %123 : vector<8x64xf32> to vector<8x64xbf16>
    %cst_34 = arith.constant dense<0.000000e+00> : vector<8x128xf32>
    %125 = tpu.matmul %124, %9, %cst_34 {dimension_numbers = #tpu.dot_dimension_numbers<[1], [0], [0], [1], [0, 0, 1, 1], [], []>} : vector<8x64xbf16>, vector<64x128xbf16>, vector<8x128xf32> -> vector<8x128xf32>
    %126 = arith.addf %125, %12 : vector<8x128xf32>
    %127 = vector.extract_strided_slice %126 {offsets = [0, 0], sizes = [8, 96], strides = [1, 1]} : vector<8x128xf32> to vector<8x96xf32>
    %128 = arith.negf %127 : vector<8x96xf32>
    %129 = math.exp %128 : vector<8x96xf32>
    %cst_35 = arith.constant 1.000000e+00 : f32
    %130 = vector.broadcast %cst_35 : f32 to vector<8x96xf32>
    %131 = arith.addf %130, %129 : vector<8x96xf32>
    %132 = arith.divf %130, %131 : vector<8x96xf32>
    %133 = vector.extract_strided_slice %126 {offsets = [0, 96], sizes = [8, 32], strides = [1, 1]} : vector<8x128xf32> to vector<8x32xf32>
    %134 = math.tanh %133 : vector<8x32xf32>
    %135 = vector.extract_strided_slice %132 {offsets = [0, 0], sizes = [8, 32], strides = [1, 1]} : vector<8x96xf32> to vector<8x32xf32>
    %136 = vector.extract_strided_slice %132 {offsets = [0, 32], sizes = [8, 32], strides = [1, 1]} : vector<8x96xf32> to vector<8x32xf32>
    %137 = vector.extract_strided_slice %132 {offsets = [0, 64], sizes = [8, 32], strides = [1, 1]} : vector<8x96xf32> to vector<8x32xf32>
    %138 = arith.mulf %136, %98 : vector<8x32xf32>
    %139 = arith.mulf %135, %134 : vector<8x32xf32>
    %140 = arith.addf %138, %139 : vector<8x32xf32>
    %141 = math.tanh %140 : vector<8x32xf32>
    %142 = arith.mulf %137, %141 : vector<8x32xf32>
    %c3_i32 = arith.constant 3 : i32
    %143 = arith.index_cast %c3_i32 : i32 to index
    %c0_36 = arith.constant 0 : index
    %c0_37 = arith.constant 0 : index
    %144 = vector.load %arg9[%143, %c0_36, %c0_37] : memref<8x8x128xf32, #tpu.memory_space<vmem>>, vector<1x8x128xf32>
    %145 = vector.shape_cast %144 : vector<1x8x128xf32> to vector<8x128xf32>
    %146 = arith.truncf %122 : vector<8x32xf32> to vector<8x32xbf16>
    %cst_38 = arith.constant dense<0.000000e+00> : vector<8x128xf32>
    %147 = tpu.matmul %146, %8, %cst_38 {dimension_numbers = #tpu.dot_dimension_numbers<[1], [0], [0], [1], [0, 0, 1, 1], [], []>} : vector<8x32xbf16>, vector<32x128xbf16>, vector<8x128xf32> -> vector<8x128xf32>
    %148 = arith.addf %145, %147 : vector<8x128xf32>
    %149 = vector.extract_strided_slice %148 {offsets = [0, 0], sizes = [8, 96], strides = [1, 1]} : vector<8x128xf32> to vector<8x96xf32>
    %150 = arith.negf %149 : vector<8x96xf32>
    %151 = math.exp %150 : vector<8x96xf32>
    %cst_39 = arith.constant 1.000000e+00 : f32
    %152 = vector.broadcast %cst_39 : f32 to vector<8x96xf32>
    %153 = arith.addf %152, %151 : vector<8x96xf32>
    %154 = arith.divf %152, %153 : vector<8x96xf32>
    %155 = vector.extract_strided_slice %148 {offsets = [0, 96], sizes = [8, 32], strides = [1, 1]} : vector<8x128xf32> to vector<8x32xf32>
    %156 = math.tanh %155 : vector<8x32xf32>
    %157 = vector.extract_strided_slice %154 {offsets = [0, 0], sizes = [8, 32], strides = [1, 1]} : vector<8x96xf32> to vector<8x32xf32>
    %158 = vector.extract_strided_slice %154 {offsets = [0, 32], sizes = [8, 32], strides = [1, 1]} : vector<8x96xf32> to vector<8x32xf32>
    %159 = vector.extract_strided_slice %154 {offsets = [0, 64], sizes = [8, 32], strides = [1, 1]} : vector<8x96xf32> to vector<8x32xf32>
    %160 = arith.mulf %158, %120 : vector<8x32xf32>
    %161 = arith.mulf %157, %156 : vector<8x32xf32>
    %162 = arith.addf %160, %161 : vector<8x32xf32>
    %163 = math.tanh %162 : vector<8x32xf32>
    %164 = arith.mulf %159, %163 : vector<8x32xf32>
    %165 = tpu.concatenate %164, %142 in 1 : vector<8x32xf32>, vector<8x32xf32> -> vector<8x64xf32>
    %166 = arith.truncf %165 : vector<8x64xf32> to vector<8x64xbf16>
    %cst_40 = arith.constant dense<0.000000e+00> : vector<8x128xf32>
    %167 = tpu.matmul %166, %9, %cst_40 {dimension_numbers = #tpu.dot_dimension_numbers<[1], [0], [0], [1], [0, 0, 1, 1], [], []>} : vector<8x64xbf16>, vector<64x128xbf16>, vector<8x128xf32> -> vector<8x128xf32>
    %168 = arith.addf %167, %12 : vector<8x128xf32>
    %169 = vector.extract_strided_slice %168 {offsets = [0, 0], sizes = [8, 96], strides = [1, 1]} : vector<8x128xf32> to vector<8x96xf32>
    %170 = arith.negf %169 : vector<8x96xf32>
    %171 = math.exp %170 : vector<8x96xf32>
    %cst_41 = arith.constant 1.000000e+00 : f32
    %172 = vector.broadcast %cst_41 : f32 to vector<8x96xf32>
    %173 = arith.addf %172, %171 : vector<8x96xf32>
    %174 = arith.divf %172, %173 : vector<8x96xf32>
    %175 = vector.extract_strided_slice %168 {offsets = [0, 96], sizes = [8, 32], strides = [1, 1]} : vector<8x128xf32> to vector<8x32xf32>
    %176 = math.tanh %175 : vector<8x32xf32>
    %177 = vector.extract_strided_slice %174 {offsets = [0, 0], sizes = [8, 32], strides = [1, 1]} : vector<8x96xf32> to vector<8x32xf32>
    %178 = vector.extract_strided_slice %174 {offsets = [0, 32], sizes = [8, 32], strides = [1, 1]} : vector<8x96xf32> to vector<8x32xf32>
    %179 = vector.extract_strided_slice %174 {offsets = [0, 64], sizes = [8, 32], strides = [1, 1]} : vector<8x96xf32> to vector<8x32xf32>
    %180 = arith.mulf %178, %140 : vector<8x32xf32>
    %181 = arith.mulf %177, %176 : vector<8x32xf32>
    %182 = arith.addf %180, %181 : vector<8x32xf32>
    %183 = math.tanh %182 : vector<8x32xf32>
    %184 = arith.mulf %179, %183 : vector<8x32xf32>
    %c4_i32 = arith.constant 4 : i32
    %185 = arith.index_cast %c4_i32 : i32 to index
    %c0_42 = arith.constant 0 : index
    %c0_43 = arith.constant 0 : index
    %186 = vector.load %arg9[%185, %c0_42, %c0_43] : memref<8x8x128xf32, #tpu.memory_space<vmem>>, vector<1x8x128xf32>
    %187 = vector.shape_cast %186 : vector<1x8x128xf32> to vector<8x128xf32>
    %188 = arith.truncf %164 : vector<8x32xf32> to vector<8x32xbf16>
    %cst_44 = arith.constant dense<0.000000e+00> : vector<8x128xf32>
    %189 = tpu.matmul %188, %8, %cst_44 {dimension_numbers = #tpu.dot_dimension_numbers<[1], [0], [0], [1], [0, 0, 1, 1], [], []>} : vector<8x32xbf16>, vector<32x128xbf16>, vector<8x128xf32> -> vector<8x128xf32>
    %190 = arith.addf %187, %189 : vector<8x128xf32>
    %191 = vector.extract_strided_slice %190 {offsets = [0, 0], sizes = [8, 96], strides = [1, 1]} : vector<8x128xf32> to vector<8x96xf32>
    %192 = arith.negf %191 : vector<8x96xf32>
    %193 = math.exp %192 : vector<8x96xf32>
    %cst_45 = arith.constant 1.000000e+00 : f32
    %194 = vector.broadcast %cst_45 : f32 to vector<8x96xf32>
    %195 = arith.addf %194, %193 : vector<8x96xf32>
    %196 = arith.divf %194, %195 : vector<8x96xf32>
    %197 = vector.extract_strided_slice %190 {offsets = [0, 96], sizes = [8, 32], strides = [1, 1]} : vector<8x128xf32> to vector<8x32xf32>
    %198 = math.tanh %197 : vector<8x32xf32>
    %199 = vector.extract_strided_slice %196 {offsets = [0, 0], sizes = [8, 32], strides = [1, 1]} : vector<8x96xf32> to vector<8x32xf32>
    %200 = vector.extract_strided_slice %196 {offsets = [0, 32], sizes = [8, 32], strides = [1, 1]} : vector<8x96xf32> to vector<8x32xf32>
    %201 = vector.extract_strided_slice %196 {offsets = [0, 64], sizes = [8, 32], strides = [1, 1]} : vector<8x96xf32> to vector<8x32xf32>
    %202 = arith.mulf %200, %162 : vector<8x32xf32>
    %203 = arith.mulf %199, %198 : vector<8x32xf32>
    %204 = arith.addf %202, %203 : vector<8x32xf32>
    %205 = math.tanh %204 : vector<8x32xf32>
    %206 = arith.mulf %201, %205 : vector<8x32xf32>
    %207 = tpu.concatenate %206, %184 in 1 : vector<8x32xf32>, vector<8x32xf32> -> vector<8x64xf32>
    %208 = arith.truncf %207 : vector<8x64xf32> to vector<8x64xbf16>
    %cst_46 = arith.constant dense<0.000000e+00> : vector<8x128xf32>
    %209 = tpu.matmul %208, %9, %cst_46 {dimension_numbers = #tpu.dot_dimension_numbers<[1], [0], [0], [1], [0, 0, 1, 1], [], []>} : vector<8x64xbf16>, vector<64x128xbf16>, vector<8x128xf32> -> vector<8x128xf32>
    %210 = arith.addf %209, %12 : vector<8x128xf32>
    %211 = vector.extract_strided_slice %210 {offsets = [0, 0], sizes = [8, 96], strides = [1, 1]} : vector<8x128xf32> to vector<8x96xf32>
    %212 = arith.negf %211 : vector<8x96xf32>
    %213 = math.exp %212 : vector<8x96xf32>
    %cst_47 = arith.constant 1.000000e+00 : f32
    %214 = vector.broadcast %cst_47 : f32 to vector<8x96xf32>
    %215 = arith.addf %214, %213 : vector<8x96xf32>
    %216 = arith.divf %214, %215 : vector<8x96xf32>
    %217 = vector.extract_strided_slice %210 {offsets = [0, 96], sizes = [8, 32], strides = [1, 1]} : vector<8x128xf32> to vector<8x32xf32>
    %218 = math.tanh %217 : vector<8x32xf32>
    %219 = vector.extract_strided_slice %216 {offsets = [0, 0], sizes = [8, 32], strides = [1, 1]} : vector<8x96xf32> to vector<8x32xf32>
    %220 = vector.extract_strided_slice %216 {offsets = [0, 32], sizes = [8, 32], strides = [1, 1]} : vector<8x96xf32> to vector<8x32xf32>
    %221 = vector.extract_strided_slice %216 {offsets = [0, 64], sizes = [8, 32], strides = [1, 1]} : vector<8x96xf32> to vector<8x32xf32>
    %222 = arith.mulf %220, %182 : vector<8x32xf32>
    %223 = arith.mulf %219, %218 : vector<8x32xf32>
    %224 = arith.addf %222, %223 : vector<8x32xf32>
    %225 = math.tanh %224 : vector<8x32xf32>
    %226 = arith.mulf %221, %225 : vector<8x32xf32>
    %c5_i32 = arith.constant 5 : i32
    %227 = arith.index_cast %c5_i32 : i32 to index
    %c0_48 = arith.constant 0 : index
    %c0_49 = arith.constant 0 : index
    %228 = vector.load %arg9[%227, %c0_48, %c0_49] : memref<8x8x128xf32, #tpu.memory_space<vmem>>, vector<1x8x128xf32>
    %229 = vector.shape_cast %228 : vector<1x8x128xf32> to vector<8x128xf32>
    %230 = arith.truncf %206 : vector<8x32xf32> to vector<8x32xbf16>
    %cst_50 = arith.constant dense<0.000000e+00> : vector<8x128xf32>
    %231 = tpu.matmul %230, %8, %cst_50 {dimension_numbers = #tpu.dot_dimension_numbers<[1], [0], [0], [1], [0, 0, 1, 1], [], []>} : vector<8x32xbf16>, vector<32x128xbf16>, vector<8x128xf32> -> vector<8x128xf32>
    %232 = arith.addf %229, %231 : vector<8x128xf32>
    %233 = vector.extract_strided_slice %232 {offsets = [0, 0], sizes = [8, 96], strides = [1, 1]} : vector<8x128xf32> to vector<8x96xf32>
    %234 = arith.negf %233 : vector<8x96xf32>
    %235 = math.exp %234 : vector<8x96xf32>
    %cst_51 = arith.constant 1.000000e+00 : f32
    %236 = vector.broadcast %cst_51 : f32 to vector<8x96xf32>
    %237 = arith.addf %236, %235 : vector<8x96xf32>
    %238 = arith.divf %236, %237 : vector<8x96xf32>
    %239 = vector.extract_strided_slice %232 {offsets = [0, 96], sizes = [8, 32], strides = [1, 1]} : vector<8x128xf32> to vector<8x32xf32>
    %240 = math.tanh %239 : vector<8x32xf32>
    %241 = vector.extract_strided_slice %238 {offsets = [0, 0], sizes = [8, 32], strides = [1, 1]} : vector<8x96xf32> to vector<8x32xf32>
    %242 = vector.extract_strided_slice %238 {offsets = [0, 32], sizes = [8, 32], strides = [1, 1]} : vector<8x96xf32> to vector<8x32xf32>
    %243 = vector.extract_strided_slice %238 {offsets = [0, 64], sizes = [8, 32], strides = [1, 1]} : vector<8x96xf32> to vector<8x32xf32>
    %244 = arith.mulf %242, %204 : vector<8x32xf32>
    %245 = arith.mulf %241, %240 : vector<8x32xf32>
    %246 = arith.addf %244, %245 : vector<8x32xf32>
    %247 = math.tanh %246 : vector<8x32xf32>
    %248 = arith.mulf %243, %247 : vector<8x32xf32>
    %249 = tpu.concatenate %248, %226 in 1 : vector<8x32xf32>, vector<8x32xf32> -> vector<8x64xf32>
    %250 = arith.truncf %249 : vector<8x64xf32> to vector<8x64xbf16>
    %cst_52 = arith.constant dense<0.000000e+00> : vector<8x128xf32>
    %251 = tpu.matmul %250, %9, %cst_52 {dimension_numbers = #tpu.dot_dimension_numbers<[1], [0], [0], [1], [0, 0, 1, 1], [], []>} : vector<8x64xbf16>, vector<64x128xbf16>, vector<8x128xf32> -> vector<8x128xf32>
    %252 = arith.addf %251, %12 : vector<8x128xf32>
    %253 = vector.extract_strided_slice %252 {offsets = [0, 0], sizes = [8, 96], strides = [1, 1]} : vector<8x128xf32> to vector<8x96xf32>
    %254 = arith.negf %253 : vector<8x96xf32>
    %255 = math.exp %254 : vector<8x96xf32>
    %cst_53 = arith.constant 1.000000e+00 : f32
    %256 = vector.broadcast %cst_53 : f32 to vector<8x96xf32>
    %257 = arith.addf %256, %255 : vector<8x96xf32>
    %258 = arith.divf %256, %257 : vector<8x96xf32>
    %259 = vector.extract_strided_slice %252 {offsets = [0, 96], sizes = [8, 32], strides = [1, 1]} : vector<8x128xf32> to vector<8x32xf32>
    %260 = math.tanh %259 : vector<8x32xf32>
    %261 = vector.extract_strided_slice %258 {offsets = [0, 0], sizes = [8, 32], strides = [1, 1]} : vector<8x96xf32> to vector<8x32xf32>
    %262 = vector.extract_strided_slice %258 {offsets = [0, 32], sizes = [8, 32], strides = [1, 1]} : vector<8x96xf32> to vector<8x32xf32>
    %263 = vector.extract_strided_slice %258 {offsets = [0, 64], sizes = [8, 32], strides = [1, 1]} : vector<8x96xf32> to vector<8x32xf32>
    %264 = arith.mulf %262, %224 : vector<8x32xf32>
    %265 = arith.mulf %261, %260 : vector<8x32xf32>
    %266 = arith.addf %264, %265 : vector<8x32xf32>
    %267 = math.tanh %266 : vector<8x32xf32>
    %268 = arith.mulf %263, %267 : vector<8x32xf32>
    %c6_i32 = arith.constant 6 : i32
    %269 = arith.index_cast %c6_i32 : i32 to index
    %c0_54 = arith.constant 0 : index
    %c0_55 = arith.constant 0 : index
    %270 = vector.load %arg9[%269, %c0_54, %c0_55] : memref<8x8x128xf32, #tpu.memory_space<vmem>>, vector<1x8x128xf32>
    %271 = vector.shape_cast %270 : vector<1x8x128xf32> to vector<8x128xf32>
    %272 = arith.truncf %248 : vector<8x32xf32> to vector<8x32xbf16>
    %cst_56 = arith.constant dense<0.000000e+00> : vector<8x128xf32>
    %273 = tpu.matmul %272, %8, %cst_56 {dimension_numbers = #tpu.dot_dimension_numbers<[1], [0], [0], [1], [0, 0, 1, 1], [], []>} : vector<8x32xbf16>, vector<32x128xbf16>, vector<8x128xf32> -> vector<8x128xf32>
    %274 = arith.addf %271, %273 : vector<8x128xf32>
    %275 = vector.extract_strided_slice %274 {offsets = [0, 0], sizes = [8, 96], strides = [1, 1]} : vector<8x128xf32> to vector<8x96xf32>
    %276 = arith.negf %275 : vector<8x96xf32>
    %277 = math.exp %276 : vector<8x96xf32>
    %cst_57 = arith.constant 1.000000e+00 : f32
    %278 = vector.broadcast %cst_57 : f32 to vector<8x96xf32>
    %279 = arith.addf %278, %277 : vector<8x96xf32>
    %280 = arith.divf %278, %279 : vector<8x96xf32>
    %281 = vector.extract_strided_slice %274 {offsets = [0, 96], sizes = [8, 32], strides = [1, 1]} : vector<8x128xf32> to vector<8x32xf32>
    %282 = math.tanh %281 : vector<8x32xf32>
    %283 = vector.extract_strided_slice %280 {offsets = [0, 0], sizes = [8, 32], strides = [1, 1]} : vector<8x96xf32> to vector<8x32xf32>
    %284 = vector.extract_strided_slice %280 {offsets = [0, 32], sizes = [8, 32], strides = [1, 1]} : vector<8x96xf32> to vector<8x32xf32>
    %285 = vector.extract_strided_slice %280 {offsets = [0, 64], sizes = [8, 32], strides = [1, 1]} : vector<8x96xf32> to vector<8x32xf32>
    %286 = arith.mulf %284, %246 : vector<8x32xf32>
    %287 = arith.mulf %283, %282 : vector<8x32xf32>
    %288 = arith.addf %286, %287 : vector<8x32xf32>
    %289 = math.tanh %288 : vector<8x32xf32>
    %290 = arith.mulf %285, %289 : vector<8x32xf32>
    %291 = tpu.concatenate %290, %268 in 1 : vector<8x32xf32>, vector<8x32xf32> -> vector<8x64xf32>
    %292 = arith.truncf %291 : vector<8x64xf32> to vector<8x64xbf16>
    %cst_58 = arith.constant dense<0.000000e+00> : vector<8x128xf32>
    %293 = tpu.matmul %292, %9, %cst_58 {dimension_numbers = #tpu.dot_dimension_numbers<[1], [0], [0], [1], [0, 0, 1, 1], [], []>} : vector<8x64xbf16>, vector<64x128xbf16>, vector<8x128xf32> -> vector<8x128xf32>
    %294 = arith.addf %293, %12 : vector<8x128xf32>
    %295 = vector.extract_strided_slice %294 {offsets = [0, 0], sizes = [8, 96], strides = [1, 1]} : vector<8x128xf32> to vector<8x96xf32>
    %296 = arith.negf %295 : vector<8x96xf32>
    %297 = math.exp %296 : vector<8x96xf32>
    %cst_59 = arith.constant 1.000000e+00 : f32
    %298 = vector.broadcast %cst_59 : f32 to vector<8x96xf32>
    %299 = arith.addf %298, %297 : vector<8x96xf32>
    %300 = arith.divf %298, %299 : vector<8x96xf32>
    %301 = vector.extract_strided_slice %294 {offsets = [0, 96], sizes = [8, 32], strides = [1, 1]} : vector<8x128xf32> to vector<8x32xf32>
    %302 = math.tanh %301 : vector<8x32xf32>
    %303 = vector.extract_strided_slice %300 {offsets = [0, 0], sizes = [8, 32], strides = [1, 1]} : vector<8x96xf32> to vector<8x32xf32>
    %304 = vector.extract_strided_slice %300 {offsets = [0, 32], sizes = [8, 32], strides = [1, 1]} : vector<8x96xf32> to vector<8x32xf32>
    %305 = vector.extract_strided_slice %300 {offsets = [0, 64], sizes = [8, 32], strides = [1, 1]} : vector<8x96xf32> to vector<8x32xf32>
    %306 = arith.mulf %304, %266 : vector<8x32xf32>
    %307 = arith.mulf %303, %302 : vector<8x32xf32>
    %308 = arith.addf %306, %307 : vector<8x32xf32>
    %309 = math.tanh %308 : vector<8x32xf32>
    %310 = arith.mulf %305, %309 : vector<8x32xf32>
    %c7_i32 = arith.constant 7 : i32
    %311 = arith.index_cast %c7_i32 : i32 to index
    %c0_60 = arith.constant 0 : index
    %c0_61 = arith.constant 0 : index
    %312 = vector.load %arg9[%311, %c0_60, %c0_61] : memref<8x8x128xf32, #tpu.memory_space<vmem>>, vector<1x8x128xf32>
    %313 = vector.shape_cast %312 : vector<1x8x128xf32> to vector<8x128xf32>
    %314 = arith.truncf %290 : vector<8x32xf32> to vector<8x32xbf16>
    %cst_62 = arith.constant dense<0.000000e+00> : vector<8x128xf32>
    %315 = tpu.matmul %314, %8, %cst_62 {dimension_numbers = #tpu.dot_dimension_numbers<[1], [0], [0], [1], [0, 0, 1, 1], [], []>} : vector<8x32xbf16>, vector<32x128xbf16>, vector<8x128xf32> -> vector<8x128xf32>
    %316 = arith.addf %313, %315 : vector<8x128xf32>
    %317 = vector.extract_strided_slice %316 {offsets = [0, 0], sizes = [8, 96], strides = [1, 1]} : vector<8x128xf32> to vector<8x96xf32>
    %318 = arith.negf %317 : vector<8x96xf32>
    %319 = math.exp %318 : vector<8x96xf32>
    %cst_63 = arith.constant 1.000000e+00 : f32
    %320 = vector.broadcast %cst_63 : f32 to vector<8x96xf32>
    %321 = arith.addf %320, %319 : vector<8x96xf32>
    %322 = arith.divf %320, %321 : vector<8x96xf32>
    %323 = vector.extract_strided_slice %316 {offsets = [0, 96], sizes = [8, 32], strides = [1, 1]} : vector<8x128xf32> to vector<8x32xf32>
    %324 = math.tanh %323 : vector<8x32xf32>
    %325 = vector.extract_strided_slice %322 {offsets = [0, 0], sizes = [8, 32], strides = [1, 1]} : vector<8x96xf32> to vector<8x32xf32>
    %326 = vector.extract_strided_slice %322 {offsets = [0, 32], sizes = [8, 32], strides = [1, 1]} : vector<8x96xf32> to vector<8x32xf32>
    %327 = vector.extract_strided_slice %322 {offsets = [0, 64], sizes = [8, 32], strides = [1, 1]} : vector<8x96xf32> to vector<8x32xf32>
    %328 = arith.mulf %326, %288 : vector<8x32xf32>
    %329 = arith.mulf %325, %324 : vector<8x32xf32>
    %330 = arith.addf %328, %329 : vector<8x32xf32>
    %331 = math.tanh %330 : vector<8x32xf32>
    %332 = arith.mulf %327, %331 : vector<8x32xf32>
    %333 = tpu.concatenate %332, %310 in 1 : vector<8x32xf32>, vector<8x32xf32> -> vector<8x64xf32>
    %334 = arith.truncf %333 : vector<8x64xf32> to vector<8x64xbf16>
    %cst_64 = arith.constant dense<0.000000e+00> : vector<8x128xf32>
    %335 = tpu.matmul %334, %9, %cst_64 {dimension_numbers = #tpu.dot_dimension_numbers<[1], [0], [0], [1], [0, 0, 1, 1], [], []>} : vector<8x64xbf16>, vector<64x128xbf16>, vector<8x128xf32> -> vector<8x128xf32>
    %336 = arith.addf %335, %12 : vector<8x128xf32>
    %337 = vector.extract_strided_slice %336 {offsets = [0, 0], sizes = [8, 96], strides = [1, 1]} : vector<8x128xf32> to vector<8x96xf32>
    %338 = arith.negf %337 : vector<8x96xf32>
    %339 = math.exp %338 : vector<8x96xf32>
    %cst_65 = arith.constant 1.000000e+00 : f32
    %340 = vector.broadcast %cst_65 : f32 to vector<8x96xf32>
    %341 = arith.addf %340, %339 : vector<8x96xf32>
    %342 = arith.divf %340, %341 : vector<8x96xf32>
    %343 = vector.extract_strided_slice %336 {offsets = [0, 96], sizes = [8, 32], strides = [1, 1]} : vector<8x128xf32> to vector<8x32xf32>
    %344 = math.tanh %343 : vector<8x32xf32>
    %345 = vector.extract_strided_slice %342 {offsets = [0, 0], sizes = [8, 32], strides = [1, 1]} : vector<8x96xf32> to vector<8x32xf32>
    %346 = vector.extract_strided_slice %342 {offsets = [0, 32], sizes = [8, 32], strides = [1, 1]} : vector<8x96xf32> to vector<8x32xf32>
    %347 = vector.extract_strided_slice %342 {offsets = [0, 64], sizes = [8, 32], strides = [1, 1]} : vector<8x96xf32> to vector<8x32xf32>
    %348 = arith.mulf %346, %308 : vector<8x32xf32>
    %349 = arith.mulf %345, %344 : vector<8x32xf32>
    %350 = arith.addf %348, %349 : vector<8x32xf32>
    %351 = math.tanh %350 : vector<8x32xf32>
    %352 = arith.mulf %347, %351 : vector<8x32xf32>
    %c8_i32 = arith.constant 8 : i32
    %353 = arith.truncf %352 : vector<8x32xf32> to vector<8x32xbf16>
    %c0_66 = arith.constant 0 : index
    %c0_67 = arith.constant 0 : index
    %354 = vector.load %arg6[%c0_66, %c0_67] : memref<32x256xbf16, #tpu.memory_space<vmem>>, vector<32x256xbf16>
    %cst_68 = arith.constant dense<0.000000e+00> : vector<8x256xf32>
    %355 = tpu.matmul %353, %354, %cst_68 {dimension_numbers = #tpu.dot_dimension_numbers<[1], [0], [0], [1], [0, 0, 1, 1], [], []>} : vector<8x32xbf16>, vector<32x256xbf16>, vector<8x256xf32> -> vector<8x256xf32>
    %c0_69 = arith.constant 0 : index
    %c0_70 = arith.constant 0 : index
    %356 = vector.load %arg7[%c0_69, %c0_70] : memref<1x256xf32, #tpu.memory_space<vmem>>, vector<1x256xf32>
    %357 = vector.broadcast %356 : vector<1x256xf32> to vector<8x256xf32>
    %358 = arith.addf %355, %357 : vector<8x256xf32>
    %c0_71 = arith.constant 0 : index
    %c0_72 = arith.constant 0 : index
    %359 = vector.load %arg8[%c0_71, %c0_72] : memref<8x256xf32, #tpu.memory_space<vmem>>, vector<8x256xf32>
    tpu.vector_store %arg8[%c0_71, %c0_72], %358 {strides = array<i32>} : memref<8x256xf32, #tpu.memory_space<vmem>>, vector<8x256xf32>,
    return
  }
}

</mosaic_0001>

<bundles_post_ra>
// kernel: tpu_custom_call.1
= control target key start
LH: loop header
LB: loop body
LE: loop exit
PB: predicated region body
PF: predicated region fallthrough
CT: control target
= control target key end

     0   :  { %13 = vsyncpa [#allocation4], 0  ;;  %s2514_s0 = inlined_call_operand.vmem [shape: bf16[64,32], index: 0, kind: input, shape index: {}]   ;;  %s2515_s1 = inlined_call_operand.vmem [shape: bf16[32,128], index: 1, kind: input, shape index: {}]   ;;  %s2516_s2 = inlined_call_operand.hbm [shape: bf16[32,128], index: 2, kind: input, shape index: {}]   ;;  %s2517_s3 = inlined_call_operand.vmem [shape: f32[1,128], index: 3, kind: input, shape index: {}]   ;;  %s2518_s4 = inlined_call_operand.vmem [shape: bf16[64,128], index: 4, kind: input, shape index: {}]   ;;  %s2519_s5 = inlined_call_operand.vmem [shape: f32[1,128], index: 5, kind: input, shape index: {}]   ;;  %s2520_s6 = inlined_call_operand.hbm [shape: bf16[32,256], index: 6, kind: input, shape index: {}]   ;;  %s2521_s7 = inlined_call_operand.vmem [shape: f32[1,256], index: 7, kind: input, shape index: {}]   ;;  %s2522_s8 = inlined_call_operand.hbm [shape: f32[8,256], index: 8, kind: output, shape index: {}]  }
   0x1   :  { %14 = vsyncpa [#allocation7], 0 }
   0x2   :  { %15 = vsyncpa [#allocation5], 0  ;;  %s2074_s27 = smov [#allocation3]  }
   0x3   :  { %s25_s28 = sshll.u32 %s2074_s27, 4  ;;  %s26_s28 = int_to_ptr.vmem [resolvable:$true] %s25_s28 }
   0x4   :  { %s2016_s29 = scalar_lea.vmem %s26_s28, 256  ;;  %p2021_p1 = scmp.lt.s32.totalorder %s26_s28, %s26_s28 }
   0x5   :  { %p2017_p0 = scmp.ne.s32.totalorder %s26_s28, %s2016_s29  ;;  %p2022_p2 = scmp.lt.s32.totalorder %s2016_s29, %s2016_s29 }
   0x7   :  { %p2023_p3 = por %p2022_p2, %p2021_p1 }
   0x9   :  { %p2024_p4 = pnand %p2023_p3, %p2017_p0 }
   0xb   :  { %2027 = shalt.err (!%p2024_p4)
}
   0xc   :  { %s2075_s30 = smov 64   ;;  %s2076_s9 = smov 4  }
   0xd   :  { %31 = dma.hbm_to_vmem [thread:$0]  %s2516_s2, 256, %s26_s28, [#allocation4], %s2075_s30, %s2075_s30, %s2076_s9  }
   0xe   :  { %s2077_s12 = smov [#allocation6]  }
   0xf   :  { %s43_s13 = sshll.u32 %s2077_s12, 4  ;;  %s44_s13 = int_to_ptr.vmem [resolvable:$true] %s43_s13 }
  0x10   :  { %s2036_s14 = scalar_lea.vmem %s44_s13, 512  ;;  %p2041_p6 = scmp.lt.s32.totalorder %s44_s13, %s44_s13 }
  0x11   :  { %p2037_p5 = scmp.ne.s32.totalorder %s44_s13, %s2036_s14  ;;  %p2042_p7 = scmp.lt.s32.totalorder %s2036_s14, %s2036_s14 }
  0x13   :  { %p2043_p8 = por %p2042_p7, %p2041_p6 }
  0x15   :  { %p2044_p9 = pnand %p2043_p8, %p2037_p5 }
  0x17   :  { %2047 = shalt.err (!%p2044_p9)
}
  0x18   :  { %s2078_s15 = smov 128   ;;  %s2079_s16 = smov 8  }
  0x19   :  { %49 = dma.hbm_to_vmem [thread:$0]  %s2520_s6, 512, %s44_s13, [#allocation7], %s2078_s15, %s2078_s15, %s2079_s16  }
  0x1a   :  { %2068 = dma.done.wait [#allocation4], 256  }
  0x1b   :  { %2069 = vsyncadd [#allocation4], 4294967040 }
  0x1c   :  { %2070 = dma.done.wait [#allocation7], 512  }
  0x1d   :  { %2071 = vsyncadd [#allocation7], 4294966784  ;;  %v2080_v0 = vmov 0.0   ;;  %vm2081_vm0 = vmmov 0   ;;  %v1861_v1 = vld [vmem:[%s2515_s1 + $0x8] sm:$0xff]   ;;  %v1863_v3 = vld [vmem:[%s2515_s1] sm:$0xff]  }
  0x1e   :  { %1689 = vmatprep.subr.bf16.mxu1 %v2080_v0  ;;  %1693 = vmatprep.mubr.msk.bf16.mxu1 %vm2081_vm0, %v2080_v0  ;;  %v2145_v2 = vld [vmem:[#allocation3 + $0x8] sm:$0xff]   ;;  %v2151_v4 = vld [vmem:[#allocation3] sm:$0xff]   ;;  %vm110_vm1 = vcmask 261120   ;;  %v2082_v7 = vmov 0   ;;  %s2083_s26 = smov 32   ;;  %v2188_v27 = vld [vmem:[%s2518_s4 + $0x18] sm:$0xff]  }
  0x1f   :  { %1677 = vmatprep.subr.bf16.mxu0 %v1861_v1  ;;  %1690 = vmatpush3.bf16.msra.mxu1 %v2145_v2  ;;  %v1865_v5 = vld [vmem:[%s2514_s0] sm:$0xff]   ;;  %v1866_v6 = vld [vmem:[%s2514_s0 + $0x8] sm:$0xff]   ;;  %v1869_v28 = vld [vmem:[%s2514_s0 + $0x10] sm:$0xff]   ;;  %vm326_vm2 = vcmask 523264   ;;  %s2085_s20 = smov [#allocation8]  }
  0x20   :  { %1678 = vmatpush3.bf16.msra.mxu0 %v1861_v1  ;;  %1691 = vmatprep.subr.bf16.mxu1 %v2080_v0  ;;  %v2177_v10 = vld [vmem:[%s2517_s3] ss:$0 sm:$0xff]  ;;  %v1870_v29 = vld [vmem:[%s2514_s0 + $0x18] sm:$0xff]   ;;  %v2200_v30 = vld [vmem:[%s2518_s4 + $0x10] sm:$0xff]   ;;  %s1543_s6 = sshll.u32 %s2085_s20, 4  ;;  %s1544_s6 = int_to_ptr.vmem [resolvable:$true] %s1543_s6 }
  0x21   :  { %1679 = vmatprep.subr.bf16.mxu0 %v1863_v3  ;;  %1681 = vmatprep.mubr.msk.bf16.mxu0 %vm110_vm1, %v1865_v5  ;;  %v2211_v31 = vld [vmem:[%s2518_s4 + $0x8] sm:$0xff]   ;;  %v2220_v33 = vld [vmem:[%s2518_s4] sm:$0xff]   ;;  %p2053_p11 = scmp.lt.s32.totalorder %s1544_s6, %s1544_s6 }
  0x22   :  { %v2259_v48 = vld [vmem:[%s2519_s5] ss:$0 sm:$0xff]  ;;  %s2084_s5 = smov 96  }
  0x23   :  { %1692 = vmatpush3.bf16.msra.mxu1 %v2151_v4 }
  0x24   :  { %1680 = vmatpush3.bf16.msra.mxu0 %v1863_v3  ;;  %1709 = vmatprep.subr.bf16.mxu1 %v2080_v0 }
  0x25   :  { %1697 = vmatprep.subr.bf16.mxu0 %v2080_v0 }
  0x26   :  { %1694 = vmatmul.mubr.bf16.vlgmr.msra.gmra.mxu1 %v2082_v7 }
  0x27   :  { %1682 = vmatmul.mubr.msk.bf16.vlgmr.msra.gmra.mxu0 %vm110_vm1, %v1866_v6  ;;  %1710 = vmatpush3.bf16.msra.mxu1 %v2145_v2 }
  0x28   :  { %1713 = vmatprep.mubr.msk.bf16.mxu1 %vm2081_vm0, %v2080_v0  ;;  %1711 = vmatprep.subr.bf16.mxu1 %v2080_v0 }
  0x29   :  { %1698 = vmatpush3.bf16.msra.mxu0 %v2188_v27  ;;  %1685 = vmatprep.mubr.msk.bf16.mxu0 %vm110_vm1, %v1869_v28 }
  0x2a   :  { %1699 = vmatprep.subr.bf16.mxu0 %v2080_v0 }
  0x2b   :  { %1712 = vmatpush3.bf16.msra.mxu1 %v2151_v4 }
  0x2c   :  { %1717 = vmatprep.subr.bf16.mxu1 %v2080_v0 }
  0x2d   :  { %1700 = vmatpush3.bf16.msra.mxu0 %v2200_v30 }
  0x2e   :  { %1701 = vmatprep.subr.bf16.mxu0 %v2080_v0 }
  0x2f   :  { %1686 = vmatmul.mubr.msk.bf16.gmra.mxu0 %vm110_vm1, %v1870_v29 }
  0x30   :  { %1705 = vmatprep.mubr.msk.bf16.mxu0 %vm2081_vm0, %v2080_v0 }
  0x31   :  { %1702 = vmatpush3.bf16.msra.mxu0 %v2211_v31 }
  0x32   :  { %1703 = vmatprep.subr.bf16.mxu0 %v2080_v0 }
  0x35   :  { %1704 = vmatpush3.bf16.msra.mxu0 %v2220_v33 }
  0x36   :  { %1729 = vmatprep.subr.bf16.mxu0 %v2080_v0 }
  0xe6   :  { %v265_v8 = vpop.f32.mrf.mxu1 }
  0xe7   :  { %v2172_v9 = vpop.f32.mrf.mxu0 }
  0xe8   :  { %v1695_v11 = vpop.f32.mrf.mxu1 }
  0xe9   :  { %v157_v12 = vpop.f32.mrf.mxu0 }
  0xea   :  { %v158_v13 = vadd.f32 %v2177_v10, %v157_v12  ;;  %v268_v14 = vpop.f32.mrf.mxu1 }
  0xeb   :  { %v2245_v41 = vpop.f32.mrf.mxu0 }
  0xec   :  { %v271_v15 = vadd.f32 %v265_v8, %v158_v13  ;;  %v1696_v16 = vpop.f32.mrf.mxu1 }
  0xed   :  { %v160_v42 = vpop.f32.mrf.mxu0 }
  0xee   :  { %1879 = vtanh.f32 %v271_v15  ;;  %v1567_v18 = vmul.f32 -1.442695, %v271_v15  ;;  %v161_v47 = vadd.f32 %v2177_v10, %v160_v42 }
  0xef   :  { %v2247_v43 = vpop.f32.mrf.mxu0 }
  0xf0   :  { %1881 = vpow2.f32 %v1567_v18 }
  0xf1   :  { %v2249_v44 = vpop.f32.mrf.mxu0 }
  0xf3   :  { %v2251_v45 = vpop.f32.mrf.mxu0 }
  0xf5   :  { %v2253_v46 = vpop.f32.mrf.mxu0 }
  0xfb   :  { %v1880_v17 = vpop.eup %1879 }
  0xfc   :  { %281 = vrot.lane.b32.xlu0 %v1880_v17, %s2083_s26 }
  0xfd   :  { %v1882_v19 = vpop.eup %1881 }
  0xfe   :  { %v275_v20 = vadd.f32 1.0, %v1882_v19 }
 0x100   :  { %1883 = vrcp.f32 %v275_v20 }
 0x10d   :  { %v1884_v21 = vpop.eup %1883 }
 0x10e   :  { %v279_v24 = vmul.f32 0.0, %v1884_v21 }
 0x16e   :  { %v282_v22 = vpop.permute.xlu0 %281 }
 0x16f   :  { %v284_v23 = vmul.f32 %v1884_v21, %v282_v22 }
 0x171   :  { %286 = vrot.lane.b32.xlu0 %v284_v23, %s2083_s26 }
 0x1e3   :  { %v287_v25 = vpop.permute.xlu0 %286 }
 0x1e4   :  { %v2182_v26 = vadd.f32 %v287_v25, %v279_v24 }
 0x1e6   :  { %1885 = vtanh.f32 %v2182_v26 }
 0x1f3   :  { %v1886_v32 = vpop.eup %1885 }
 0x1f4   :  { %292 = vrot.lane.b32.xlu1 %v1886_v32, %s2083_s26 }
 0x266   :  { %v293_v34 = vpop.permute.xlu1 %292 }
 0x267   :  { %v295_v35 = vmul.f32 %v1884_v21, %v293_v34 }
 0x269   :  { %297 = vrot.lane.b32.xlu1 %v295_v35, %s2075_s30  ;;  %v396_v36 = vpack.c.bf16 %v295_v35, %v295_v35 }
 0x26b   :  { %398 = vrot.lane.b32.xlu0 %v396_v36, %s2075_s30 }
 0x2db   :  { %v298_v37 = vpop.permute.xlu1 %297 }
 0x2dc   :  { %v300_v38 = vsel %vm110_vm1, %v298_v37, 0.0  ;;  %v166_v37 = vadd.f32 %v2172_v9, %v2177_v10 }
 0x2dd   :  { %v301_v39 = vpack.c.bf16 %v300_v38, %v300_v38  ;;  %v399_v40 = vpop.permute.xlu0 %398 }
 0x2de   :  { %1714 = vmatmul.mubr.msk.bf16.vlgmr.msra.gmra.mxu1 %vm110_vm1, %v399_v40 }
 0x2df   :  { %1706 = vmatmul.mubr.msk.bf16.vlgmr.msra.gmra.mxu0 %vm326_vm2, %v301_v39  ;;  %1718 = vmatpush3.bf16.msra.mxu1 %v2188_v27 }
 0x2e0   :  { %1719 = vmatprep.subr.bf16.mxu1 %v2080_v0  ;;  %1730 = vmatpush3.bf16.msra.mxu0 %v2145_v2 }
 0x2e1   :  { %1731 = vmatprep.subr.bf16.mxu0 %v2080_v0  ;;  %1725 = vmatprep.mubr.msk.bf16.mxu1 %vm2081_vm0, %v2080_v0 }
 0x2e2   :  { %1733 = vmatprep.mubr.msk.bf16.mxu0 %vm2081_vm0, %v2080_v0 }
 0x2e3   :  { %1720 = vmatpush3.bf16.msra.mxu1 %v2200_v30 }
 0x2e4   :  { %1721 = vmatprep.subr.bf16.mxu1 %v2080_v0  ;;  %1732 = vmatpush3.bf16.msra.mxu0 %v2151_v4 }
 0x2e5   :  { %1737 = vmatprep.subr.bf16.mxu0 %v2080_v0 }
 0x2e7   :  { %1722 = vmatpush3.bf16.msra.mxu1 %v2211_v31 }
 0x2e8   :  { %1723 = vmatprep.subr.bf16.mxu1 %v2080_v0 }
 0x2eb   :  { %1724 = vmatpush3.bf16.msra.mxu1 %v2220_v33 }
 0x2ec   :  { %1749 = vmatprep.subr.bf16.mxu1 %v2080_v0 }
 0x39e   :  { %v437_v49 = vpop.f32.mrf.mxu1 }
 0x39f   :  { %v443_v50 = vadd.f32 %v437_v49, %v161_v47  ;;  %v364_v51 = vpop.f32.mrf.mxu0 }
 0x3a0   :  { %v365_v52 = vadd.f32 %v2259_v48, %v364_v51  ;;  %v1715_v53 = vpop.f32.mrf.mxu1 }
 0x3a1   :  { %1887 = vtanh.f32 %v443_v50  ;;  %v1707_v54 = vpop.f32.mrf.mxu0  ;;  %v1575_v61 = vmul.f32 -1.442695, %v443_v50 }
 0x3a2   :  { %1889 = vtanh.f32 %v365_v52  ;;  %v440_v55 = vpop.f32.mrf.mxu1  ;;  %v1573_v62 = vmul.f32 -1.442695, %v365_v52 }
 0x3a3   :  { %v367_v56 = vpop.f32.mrf.mxu0  ;;  %1891 = vpow2.f32 %v1575_v61 }
 0x3a4   :  { %v1716_v57 = vpop.f32.mrf.mxu1  ;;  %1893 = vpow2.f32 %v1573_v62 }
 0x3a5   :  { %v1708_v58 = vpop.f32.mrf.mxu0 }
 0x3ae   :  { %v1888_v59 = vpop.eup %1887 }
 0x3af   :  { %v1890_v60 = vpop.eup %1889  ;;  %453 = vrot.lane.b32.xlu0 %v1888_v59, %s2083_s26 }
 0x3b0   :  { %379 = vrot.lane.b32.xlu1 %v1890_v60, %s2083_s26  ;;  %v1892_v63 = vpop.eup %1891 }
 0x3b1   :  { %v1894_v1 = vpop.eup %1893  ;;  %v447_v3 = vadd.f32 1.0, %v1892_v63 }
 0x3b2   :  { %v373_v5 = vadd.f32 1.0, %v1894_v1 }
 0x3b3   :  { %1895 = vrcp.f32 %v447_v3 }
 0x3b4   :  { %1897 = vrcp.f32 %v373_v5 }
 0x3c0   :  { %v1896_v6 = vpop.eup %1895 }
 0x3c1   :  { %v1898_v11 = vpop.eup %1897  ;;  %v451_v15 = vmul.f32 %v1896_v6, %v2182_v26 }
 0x3c2   :  { %v377_v17 = vmul.f32 0.0, %v1898_v11 }
 0x421   :  { %v454_v8 = vpop.permute.xlu0 %453 }
 0x422   :  { %v456_v12 = vmul.f32 %v1896_v6, %v454_v8  ;;  %v380_v13 = vpop.permute.xlu1 %379 }
 0x423   :  { %v382_v14 = vmul.f32 %v1898_v11, %v380_v13 }
 0x424   :  { %458 = vrot.lane.b32.xlu0 %v456_v12, %s2083_s26 }
 0x425   :  { %384 = vrot.lane.b32.xlu1 %v382_v14, %s2083_s26 }
 0x496   :  { %v459_v16 = vpop.permute.xlu0 %458 }
 0x497   :  { %v2267_v18 = vadd.f32 %v459_v16, %v451_v15  ;;  %v385_v19 = vpop.permute.xlu1 %384 }
 0x498   :  { %v2269_v20 = vadd.f32 %v385_v19, %v377_v17 }
 0x499   :  { %1899 = vtanh.f32 %v2267_v18 }
 0x49a   :  { %1901 = vtanh.f32 %v2269_v20 }
 0x4a6   :  { %v1900_v21 = vpop.eup %1899 }
 0x4a7   :  { %v1902_v22 = vpop.eup %1901  ;;  %464 = vrot.lane.b32.xlu0 %v1900_v21, %s2083_s26 }
 0x4a8   :  { %390 = vrot.lane.b32.xlu1 %v1902_v22, %s2083_s26 }
 0x519   :  { %v465_v23 = vpop.permute.xlu0 %464 }
 0x51a   :  { %v467_v24 = vmul.f32 %v1896_v6, %v465_v23  ;;  %v391_v25 = vpop.permute.xlu1 %390 }
 0x51b   :  { %v393_v26 = vmul.f32 %v1898_v11, %v391_v25 }
 0x51c   :  { %469 = vrot.lane.b32.xlu1 %v467_v24, %s2075_s30  ;;  %v547_v28 = vpack.c.bf16 %v467_v24, %v467_v24 }
 0x51d   :  { %473 = vrot.lane.b32.xlu0 %v393_v26, %s2084_s5 }
 0x520   :  { %549 = vrot.lane.b32.xlu1 %v547_v28, %s2075_s30  ;;  %v169_v28 = vadd.f32 %v2245_v41, %v2177_v10 }
 0x58e   :  { %v470_v29 = vpop.permute.xlu1 %469 }
 0x58f   :  { %v474_v32 = vpop.permute.xlu0 %473 }
 0x590   :  { %v476_v34 = vsel %vm110_vm1, %v470_v29, %v474_v32 }
 0x591   :  { %v477_v35 = vpack.c.bf16 %v476_v34, %v476_v34 }
 0x592   :  { %v550_v36 = vpop.permute.xlu1 %549 }
 0x593   :  { %1726 = vmatmul.mubr.msk.bf16.vlgmr.msra.gmra.mxu1 %vm326_vm2, %v477_v35  ;;  %1734 = vmatmul.mubr.msk.bf16.vlgmr.msra.gmra.mxu0 %vm110_vm1, %v550_v36 }
 0x594   :  { %1738 = vmatpush3.bf16.msra.mxu0 %v2188_v27  ;;  %1750 = vmatpush3.bf16.msra.mxu1 %v2145_v2 }
 0x595   :  { %1739 = vmatprep.subr.bf16.mxu0 %v2080_v0  ;;  %1751 = vmatprep.subr.bf16.mxu1 %v2080_v0 }
 0x596   :  { %1745 = vmatprep.mubr.msk.bf16.mxu0 %vm2081_vm0, %v2080_v0  ;;  %1753 = vmatprep.mubr.msk.bf16.mxu1 %vm2081_vm0, %v2080_v0 }
 0x598   :  { %1740 = vmatpush3.bf16.msra.mxu0 %v2200_v30  ;;  %1752 = vmatpush3.bf16.msra.mxu1 %v2151_v4 }
 0x599   :  { %1741 = vmatprep.subr.bf16.mxu0 %v2080_v0  ;;  %1757 = vmatprep.subr.bf16.mxu1 %v2080_v0 }
 0x59c   :  { %1742 = vmatpush3.bf16.msra.mxu0 %v2211_v31 }
 0x59d   :  { %1743 = vmatprep.subr.bf16.mxu0 %v2080_v0 }
 0x5a0   :  { %1744 = vmatpush3.bf16.msra.mxu0 %v2220_v33 }
 0x5a1   :  { %1769 = vmatprep.subr.bf16.mxu0 %v2080_v0 }
 0x653   :  { %v515_v38 = vpop.f32.mrf.mxu1  ;;  %v588_v39 = vpop.f32.mrf.mxu0 }
 0x654   :  { %v516_v40 = vadd.f32 %v2259_v48, %v515_v38  ;;  %v594_v42 = vadd.f32 %v588_v39, %v166_v37 }
 0x655   :  { %v1727_v47 = vpop.f32.mrf.mxu1  ;;  %v1735_v49 = vpop.f32.mrf.mxu0 }
 0x656   :  { %1903 = vtanh.f32 %v516_v40  ;;  %v1577_v9 = vmul.f32 -1.442695, %v516_v40  ;;  %v1579_v56 = vmul.f32 -1.442695, %v594_v42 }
 0x657   :  { %1905 = vtanh.f32 %v594_v42  ;;  %v518_v50 = vpop.f32.mrf.mxu1  ;;  %v591_v51 = vpop.f32.mrf.mxu0 }
 0x658   :  { %1907 = vpow2.f32 %v1577_v9 }
 0x659   :  { %v1728_v52 = vpop.f32.mrf.mxu1  ;;  %v1736_v53 = vpop.f32.mrf.mxu0  ;;  %1909 = vpow2.f32 %v1579_v56 }
 0x663   :  { %v1904_v54 = vpop.eup %1903 }
 0x664   :  { %v1906_v55 = vpop.eup %1905  ;;  %530 = vrot.lane.b32.xlu0 %v1904_v54, %s2083_s26 }
 0x665   :  { %604 = vrot.lane.b32.xlu1 %v1906_v55, %s2083_s26  ;;  %v1908_v57 = vpop.eup %1907 }
 0x666   :  { %v1910_v58 = vpop.eup %1909  ;;  %v524_v59 = vadd.f32 1.0, %v1908_v57 }
 0x667   :  { %v598_v60 = vadd.f32 1.0, %v1910_v58 }
 0x668   :  { %1911 = vrcp.f32 %v524_v59 }
 0x669   :  { %1913 = vrcp.f32 %v598_v60 }
 0x675   :  { %v1912_v61 = vpop.eup %1911 }
 0x676   :  { %v1914_v63 = vpop.eup %1913  ;;  %v528_v6 = vmul.f32 %v1912_v61, %v2269_v20 }
 0x677   :  { %v602_v8 = vmul.f32 %v1914_v63, %v2267_v18 }
 0x6d6   :  { %v531_v62 = vpop.permute.xlu0 %530 }
 0x6d7   :  { %v605_v1 = vpop.permute.xlu1 %604  ;;  %v533_v3 = vmul.f32 %v1912_v61, %v531_v62 }
 0x6d8   :  { %v607_v5 = vmul.f32 %v1914_v63, %v605_v1 }
 0x6d9   :  { %535 = vrot.lane.b32.xlu0 %v533_v3, %s2083_s26 }
 0x6da   :  { %609 = vrot.lane.b32.xlu1 %v607_v5, %s2083_s26 }
 0x74b   :  { %v536_v11 = vpop.permute.xlu0 %535 }
 0x74c   :  { %v610_v12 = vpop.permute.xlu1 %609  ;;  %v2306_v13 = vadd.f32 %v536_v11, %v528_v6 }
 0x74d   :  { %v2308_v14 = vadd.f32 %v610_v12, %v602_v8 }
 0x74e   :  { %1915 = vtanh.f32 %v2306_v13 }
 0x74f   :  { %1917 = vtanh.f32 %v2308_v14 }
 0x75b   :  { %v1916_v15 = vpop.eup %1915 }
 0x75c   :  { %v1918_v16 = vpop.eup %1917  ;;  %541 = vrot.lane.b32.xlu0 %v1916_v15, %s2083_s26 }
 0x75d   :  { %615 = vrot.lane.b32.xlu1 %v1918_v16, %s2083_s26 }
 0x7ce   :  { %v542_v17 = vpop.permute.xlu0 %541 }
 0x7cf   :  { %v616_v19 = vpop.permute.xlu1 %615  ;;  %v544_v20 = vmul.f32 %v1912_v61, %v542_v17 }
 0x7d0   :  { %v618_v18 = vmul.f32 %v1914_v63, %v616_v19 }
 0x7d1   :  { %624 = vrot.lane.b32.xlu1 %v544_v20, %s2084_s5 }
 0x7d2   :  { %620 = vrot.lane.b32.xlu0 %v618_v18, %s2075_s30  ;;  %v698_v21 = vpack.c.bf16 %v618_v18, %v618_v18  ;;  %v174_v18 = vadd.f32 %v2177_v10, %v2249_v44 }
 0x7d6   :  { %700 = vrot.lane.b32.xlu0 %v698_v21, %s2075_s30 }
 0x843   :  { %v625_v22 = vpop.permute.xlu1 %624 }
 0x844   :  { %v621_v23 = vpop.permute.xlu0 %620 }
 0x845   :  { %v627_v24 = vsel %vm110_vm1, %v621_v23, %v625_v22 }
 0x846   :  { %v628_v25 = vpack.c.bf16 %v627_v24, %v627_v24 }
 0x848   :  { %1746 = vmatmul.mubr.msk.bf16.vlgmr.msra.gmra.mxu0 %vm326_vm2, %v628_v25  ;;  %v701_v26 = vpop.permute.xlu0 %700 }
 0x849   :  { %1754 = vmatmul.mubr.msk.bf16.vlgmr.msra.gmra.mxu1 %vm110_vm1, %v701_v26  ;;  %1770 = vmatpush3.bf16.msra.mxu0 %v2145_v2 }
 0x84a   :  { %1758 = vmatpush3.bf16.msra.mxu1 %v2188_v27  ;;  %1771 = vmatprep.subr.bf16.mxu0 %v2080_v0 }
 0x84b   :  { %1759 = vmatprep.subr.bf16.mxu1 %v2080_v0  ;;  %1765 = vmatprep.mubr.msk.bf16.mxu1 %vm2081_vm0, %v2080_v0 }
 0x84c   :  { %1773 = vmatprep.mubr.msk.bf16.mxu0 %vm2081_vm0, %v2080_v0 }
 0x84d   :  { %1772 = vmatpush3.bf16.msra.mxu0 %v2151_v4 }
 0x84e   :  { %1760 = vmatpush3.bf16.msra.mxu1 %v2200_v30  ;;  %1777 = vmatprep.subr.bf16.mxu0 %v2080_v0 }
 0x84f   :  { %1761 = vmatprep.subr.bf16.mxu1 %v2080_v0 }
 0x852   :  { %1762 = vmatpush3.bf16.msra.mxu1 %v2211_v31 }
 0x853   :  { %1763 = vmatprep.subr.bf16.mxu1 %v2080_v0 }
 0x856   :  { %1764 = vmatpush3.bf16.msra.mxu1 %v2220_v33 }
 0x857   :  { %1789 = vmatprep.subr.bf16.mxu1 %v2080_v0 }
 0x908   :  { %v666_v29 = vpop.f32.mrf.mxu0 }
 0x909   :  { %v667_v32 = vadd.f32 %v2259_v48, %v666_v29  ;;  %v739_v34 = vpop.f32.mrf.mxu1 }
 0x90a   :  { %v745_v35 = vadd.f32 %v739_v34, %v169_v28  ;;  %v1747_v36 = vpop.f32.mrf.mxu0 }
 0x90b   :  { %1919 = vtanh.f32 %v667_v32  ;;  %v1755_v37 = vpop.f32.mrf.mxu1  ;;  %v1581_v41 = vmul.f32 -1.442695, %v667_v32 }
 0x90c   :  { %1921 = vtanh.f32 %v745_v35  ;;  %v669_v38 = vpop.f32.mrf.mxu0  ;;  %v1583_v50 = vmul.f32 -1.442695, %v745_v35 }
 0x90d   :  { %v742_v39 = vpop.f32.mrf.mxu1  ;;  %1923 = vpow2.f32 %v1581_v41 }
 0x90e   :  { %v1748_v40 = vpop.f32.mrf.mxu0  ;;  %1925 = vpow2.f32 %v1583_v50 }
 0x90f   :  { %v1756_v42 = vpop.f32.mrf.mxu1 }
 0x918   :  { %v1920_v47 = vpop.eup %1919 }
 0x919   :  { %v1922_v49 = vpop.eup %1921  ;;  %681 = vrot.lane.b32.xlu1 %v1920_v47, %s2083_s26 }
 0x91a   :  { %755 = vrot.lane.b32.xlu0 %v1922_v49, %s2083_s26  ;;  %v1924_v51 = vpop.eup %1923 }
 0x91b   :  { %v1926_v52 = vpop.eup %1925  ;;  %v675_v53 = vadd.f32 1.0, %v1924_v51 }
 0x91c   :  { %v749_v54 = vadd.f32 1.0, %v1926_v52 }
 0x91d   :  { %1927 = vrcp.f32 %v675_v53 }
 0x91e   :  { %1929 = vrcp.f32 %v749_v54 }
 0x92a   :  { %v1928_v55 = vpop.eup %1927 }
 0x92b   :  { %v1930_v56 = vpop.eup %1929  ;;  %v679_v60 = vmul.f32 %v1928_v55, %v2306_v13 }
 0x92c   :  { %v753_v62 = vmul.f32 %v1930_v56, %v2308_v14 }
 0x98b   :  { %v682_v9 = vpop.permute.xlu1 %681 }
 0x98c   :  { %v684_v57 = vmul.f32 %v1928_v55, %v682_v9  ;;  %v756_v58 = vpop.permute.xlu0 %755 }
 0x98d   :  { %v758_v59 = vmul.f32 %v1930_v56, %v756_v58 }
 0x98e   :  { %686 = vrot.lane.b32.xlu1 %v684_v57, %s2083_s26 }
 0x98f   :  { %760 = vrot.lane.b32.xlu0 %v758_v59, %s2083_s26 }
 0xa00   :  { %v687_v61 = vpop.permute.xlu1 %686 }
 0xa01   :  { %v2345_v63 = vadd.f32 %v687_v61, %v679_v60  ;;  %v761_v1 = vpop.permute.xlu0 %760 }
 0xa02   :  { %v2347_v3 = vadd.f32 %v761_v1, %v753_v62 }
 0xa03   :  { %1931 = vtanh.f32 %v2345_v63 }
 0xa04   :  { %1933 = vtanh.f32 %v2347_v3 }
 0xa10   :  { %v1932_v5 = vpop.eup %1931 }
 0xa11   :  { %v1934_v6 = vpop.eup %1933  ;;  %692 = vrot.lane.b32.xlu1 %v1932_v5, %s2083_s26 }
 0xa12   :  { %766 = vrot.lane.b32.xlu0 %v1934_v6, %s2083_s26 }
 0xa83   :  { %v693_v8 = vpop.permute.xlu1 %692 }
 0xa84   :  { %v695_v11 = vmul.f32 %v1928_v55, %v693_v8  ;;  %v767_v12 = vpop.permute.xlu0 %766 }
 0xa85   :  { %v769_v13 = vmul.f32 %v1930_v56, %v767_v12  ;;  %v177_v12 = vadd.f32 %v2177_v10, %v2253_v46 }
 0xa86   :  { %775 = vrot.lane.b32.xlu0 %v695_v11, %s2084_s5 }
 0xa87   :  { %771 = vrot.lane.b32.xlu1 %v769_v13, %s2075_s30  ;;  %v849_v14 = vpack.c.bf16 %v769_v13, %v769_v13 }
 0xa8b   :  { %851 = vrot.lane.b32.xlu1 %v849_v14, %s2075_s30 }
 0xaf8   :  { %v776_v15 = vpop.permute.xlu0 %775 }
 0xaf9   :  { %v772_v16 = vpop.permute.xlu1 %771 }
 0xafa   :  { %v778_v17 = vsel %vm110_vm1, %v772_v16, %v776_v15 }
 0xafb   :  { %v779_v19 = vpack.c.bf16 %v778_v17, %v778_v17 }
 0xafd   :  { %v852_v20 = vpop.permute.xlu1 %851  ;;  %1766 = vmatmul.mubr.msk.bf16.vlgmr.msra.gmra.mxu1 %vm326_vm2, %v779_v19 }
 0xafe   :  { %1774 = vmatmul.mubr.msk.bf16.vlgmr.msra.gmra.mxu0 %vm110_vm1, %v852_v20  ;;  %1790 = vmatpush3.bf16.msra.mxu1 %v2145_v2 }
 0xaff   :  { %1778 = vmatpush3.bf16.msra.mxu0 %v2188_v27  ;;  %1791 = vmatprep.subr.bf16.mxu1 %v2080_v0 }
 0xb00   :  { %1779 = vmatprep.subr.bf16.mxu0 %v2080_v0  ;;  %1785 = vmatprep.mubr.msk.bf16.mxu0 %vm2081_vm0, %v2080_v0 }
 0xb01   :  { %1793 = vmatprep.mubr.msk.bf16.mxu1 %vm2081_vm0, %v2080_v0 }
 0xb02   :  { %1792 = vmatpush3.bf16.msra.mxu1 %v2151_v4 }
 0xb03   :  { %1780 = vmatpush3.bf16.msra.mxu0 %v2200_v30  ;;  %1797 = vmatprep.subr.bf16.mxu1 %v2080_v0 }
 0xb04   :  { %1781 = vmatprep.subr.bf16.mxu0 %v2080_v0 }
 0xb07   :  { %1782 = vmatpush3.bf16.msra.mxu0 %v2211_v31 }
 0xb08   :  { %1783 = vmatprep.subr.bf16.mxu0 %v2080_v0 }
 0xb0b   :  { %1784 = vmatpush3.bf16.msra.mxu0 %v2220_v33 }
 0xb0c   :  { %1809 = vmatprep.subr.bf16.mxu0 %v2080_v0 }
 0xbbd   :  { %v817_v21 = vpop.f32.mrf.mxu1 }
 0xbbe   :  { %v818_v22 = vadd.f32 %v2259_v48, %v817_v21  ;;  %v890_v23 = vpop.f32.mrf.mxu0 }
 0xbbf   :  { %v896_v24 = vadd.f32 %v890_v23, %v174_v18  ;;  %v1767_v25 = vpop.f32.mrf.mxu1 }
 0xbc0   :  { %1935 = vtanh.f32 %v818_v22  ;;  %v1775_v26 = vpop.f32.mrf.mxu0  ;;  %v1585_v44 = vmul.f32 -1.442695, %v818_v22 }
 0xbc1   :  { %1937 = vtanh.f32 %v896_v24  ;;  %v820_v28 = vpop.f32.mrf.mxu1  ;;  %v1587_v37 = vmul.f32 -1.442695, %v896_v24 }
 0xbc2   :  { %v893_v29 = vpop.f32.mrf.mxu0  ;;  %1939 = vpow2.f32 %v1585_v44 }
 0xbc3   :  { %v1768_v32 = vpop.f32.mrf.mxu1  ;;  %1941 = vpow2.f32 %v1587_v37 }
 0xbc4   :  { %v1776_v34 = vpop.f32.mrf.mxu0 }
 0xbcd   :  { %v1936_v35 = vpop.eup %1935 }
 0xbce   :  { %v1938_v36 = vpop.eup %1937  ;;  %832 = vrot.lane.b32.xlu0 %v1936_v35, %s2083_s26 }
 0xbcf   :  { %906 = vrot.lane.b32.xlu1 %v1938_v36, %s2083_s26  ;;  %v1940_v38 = vpop.eup %1939 }
 0xbd0   :  { %v1942_v39 = vpop.eup %1941  ;;  %v826_v40 = vadd.f32 1.0, %v1940_v38 }
 0xbd1   :  { %v900_v42 = vadd.f32 1.0, %v1942_v39 }
 0xbd2   :  { %1943 = vrcp.f32 %v826_v40 }
 0xbd3   :  { %1945 = vrcp.f32 %v900_v42 }
 0xbdf   :  { %v1944_v47 = vpop.eup %1943 }
 0xbe0   :  { %v1946_v41 = vpop.eup %1945  ;;  %v830_v53 = vmul.f32 %v1944_v47, %v2345_v63 }
 0xbe1   :  { %v904_v55 = vmul.f32 %v1946_v41, %v2347_v3 }
 0xc40   :  { %v833_v49 = vpop.permute.xlu0 %832 }
 0xc41   :  { %v835_v50 = vmul.f32 %v1944_v47, %v833_v49  ;;  %v907_v51 = vpop.permute.xlu1 %906 }
 0xc42   :  { %v909_v52 = vmul.f32 %v1946_v41, %v907_v51 }
 0xc43   :  { %837 = vrot.lane.b32.xlu0 %v835_v50, %s2083_s26 }
 0xc44   :  { %911 = vrot.lane.b32.xlu1 %v909_v52, %s2083_s26 }
 0xcb5   :  { %v838_v54 = vpop.permute.xlu0 %837 }
 0xcb6   :  { %v2384_v9 = vadd.f32 %v838_v54, %v830_v53  ;;  %v912_v56 = vpop.permute.xlu1 %911 }
 0xcb7   :  { %v2386_v57 = vadd.f32 %v912_v56, %v904_v55 }
 0xcb8   :  { %1947 = vtanh.f32 %v2384_v9 }
 0xcb9   :  { %1949 = vtanh.f32 %v2386_v57 }
 0xcc5   :  { %v1948_v58 = vpop.eup %1947 }
 0xcc6   :  { %v1950_v59 = vpop.eup %1949  ;;  %843 = vrot.lane.b32.xlu0 %v1948_v58, %s2083_s26 }
 0xcc7   :  { %917 = vrot.lane.b32.xlu1 %v1950_v59, %s2083_s26 }
 0xd38   :  { %v844_v60 = vpop.permute.xlu0 %843 }
 0xd39   :  { %v846_v61 = vmul.f32 %v1944_v47, %v844_v60  ;;  %v918_v62 = vpop.permute.xlu1 %917 }
 0xd3a   :  { %v920_v63 = vmul.f32 %v1946_v41, %v918_v62 }
 0xd3b   :  { %926 = vrot.lane.b32.xlu1 %v846_v61, %s2084_s5 }
 0xd3c   :  { %922 = vrot.lane.b32.xlu0 %v920_v63, %s2075_s30  ;;  %v1000_v1 = vpack.c.bf16 %v920_v63, %v920_v63 }
 0xd40   :  { %1002 = vrot.lane.b32.xlu0 %v1000_v1, %s2075_s30 }
 0xdad   :  { %v927_v3 = vpop.permute.xlu1 %926 }
 0xdae   :  { %v923_v5 = vpop.permute.xlu0 %922 }
 0xdaf   :  { %v929_v6 = vsel %vm110_vm1, %v923_v5, %v927_v3 }
 0xdb0   :  { %v930_v8 = vpack.c.bf16 %v929_v6, %v929_v6 }
 0xdb2   :  { %1786 = vmatmul.mubr.msk.bf16.vlgmr.msra.gmra.mxu0 %vm326_vm2, %v930_v8  ;;  %v1003_v11 = vpop.permute.xlu0 %1002 }
 0xdb3   :  { %1794 = vmatmul.mubr.msk.bf16.vlgmr.msra.gmra.mxu1 %vm110_vm1, %v1003_v11  ;;  %1810 = vmatpush3.bf16.msra.mxu0 %v2145_v2 }
 0xdb4   :  { %1798 = vmatpush3.bf16.msra.mxu1 %v2188_v27  ;;  %1811 = vmatprep.subr.bf16.mxu0 %v2080_v0 }
 0xdb5   :  { %1799 = vmatprep.subr.bf16.mxu1 %v2080_v0  ;;  %1805 = vmatprep.mubr.msk.bf16.mxu1 %vm2081_vm0, %v2080_v0 }
 0xdb6   :  { %1813 = vmatprep.mubr.msk.bf16.mxu0 %vm2081_vm0, %v2080_v0 }
 0xdb7   :  { %1812 = vmatpush3.bf16.msra.mxu0 %v2151_v4 }
 0xdb8   :  { %1800 = vmatpush3.bf16.msra.mxu1 %v2200_v30  ;;  %1817 = vmatprep.subr.bf16.mxu0 %v2080_v0 }
 0xdb9   :  { %1801 = vmatprep.subr.bf16.mxu1 %v2080_v0 }
 0xdbc   :  { %1802 = vmatpush3.bf16.msra.mxu1 %v2211_v31 }
 0xdbd   :  { %1803 = vmatprep.subr.bf16.mxu1 %v2080_v0 }
 0xdc0   :  { %1804 = vmatpush3.bf16.msra.mxu1 %v2220_v33 }
 0xdc1   :  { %1829 = vmatprep.subr.bf16.mxu1 %v2080_v0 }
 0xe72   :  { %v968_v13 = vpop.f32.mrf.mxu0 }
 0xe73   :  { %v969_v14 = vadd.f32 %v2259_v48, %v968_v13  ;;  %v1041_v15 = vpop.f32.mrf.mxu1 }
 0xe74   :  { %v1047_v16 = vadd.f32 %v1041_v15, %v177_v12  ;;  %v1787_v17 = vpop.f32.mrf.mxu0 }
 0xe75   :  { %1951 = vtanh.f32 %v969_v14  ;;  %v1795_v19 = vpop.f32.mrf.mxu1  ;;  %v1589_v46 = vmul.f32 -1.442695, %v969_v14 }
 0xe76   :  { %1953 = vtanh.f32 %v1047_v16  ;;  %v971_v20 = vpop.f32.mrf.mxu0  ;;  %v1591_v25 = vmul.f32 -1.442695, %v1047_v16 }
 0xe77   :  { %v1044_v18 = vpop.f32.mrf.mxu1  ;;  %1955 = vpow2.f32 %v1589_v46 }
 0xe78   :  { %v1788_v21 = vpop.f32.mrf.mxu0  ;;  %1957 = vpow2.f32 %v1591_v25 }
 0xe79   :  { %v1796_v22 = vpop.f32.mrf.mxu1 }
 0xe82   :  { %v1952_v23 = vpop.eup %1951 }
 0xe83   :  { %v1954_v24 = vpop.eup %1953  ;;  %983 = vrot.lane.b32.xlu1 %v1952_v23, %s2083_s26 }
 0xe84   :  { %1057 = vrot.lane.b32.xlu0 %v1954_v24, %s2083_s26  ;;  %v1956_v26 = vpop.eup %1955 }
 0xe85   :  { %v1958_v28 = vpop.eup %1957  ;;  %v977_v29 = vadd.f32 1.0, %v1956_v26 }
 0xe86   :  { %v1051_v32 = vadd.f32 1.0, %v1958_v28 }
 0xe87   :  { %1959 = vrcp.f32 %v977_v29 }
 0xe88   :  { %1961 = vrcp.f32 %v1051_v32 }
 0xe94   :  { %v1960_v34 = vpop.eup %1959 }
 0xe95   :  { %v1962_v36 = vpop.eup %1961  ;;  %v981_v39 = vmul.f32 %v1960_v34, %v2384_v9 }
 0xe96   :  { %v1055_v42 = vmul.f32 %v1962_v36, %v2386_v57 }
 0xef5   :  { %v984_v35 = vpop.permute.xlu1 %983 }
 0xef6   :  { %v986_v44 = vmul.f32 %v1960_v34, %v984_v35  ;;  %v1058_v37 = vpop.permute.xlu0 %1057 }
 0xef7   :  { %v1060_v38 = vmul.f32 %v1962_v36, %v1058_v37 }
 0xef8   :  { %988 = vrot.lane.b32.xlu1 %v986_v44, %s2083_s26 }
 0xef9   :  { %1062 = vrot.lane.b32.xlu0 %v1060_v38, %s2083_s26 }
 0xf6a   :  { %v989_v40 = vpop.permute.xlu1 %988 }
 0xf6b   :  { %v2423_v47 = vadd.f32 %v989_v40, %v981_v39  ;;  %v1063_v49 = vpop.permute.xlu0 %1062 }
 0xf6c   :  { %v2425_v41 = vadd.f32 %v1063_v49, %v1055_v42 }
 0xf6d   :  { %1963 = vtanh.f32 %v2423_v47 }
 0xf6e   :  { %1965 = vtanh.f32 %v2425_v41 }
 0xf7a   :  { %v1964_v50 = vpop.eup %1963 }
 0xf7b   :  { %v1966_v51 = vpop.eup %1965  ;;  %994 = vrot.lane.b32.xlu1 %v1964_v50, %s2083_s26 }
 0xf7c   :  { %1068 = vrot.lane.b32.xlu0 %v1966_v51, %s2083_s26 }
 0xfed   :  { %v995_v52 = vpop.permute.xlu1 %994 }
 0xfee   :  { %v997_v53 = vmul.f32 %v1960_v34, %v995_v52  ;;  %v1069_v54 = vpop.permute.xlu0 %1068 }
 0xfef   :  { %v1071_v55 = vmul.f32 %v1962_v36, %v1069_v54 }
 0xff0   :  { %1077 = vrot.lane.b32.xlu0 %v997_v53, %s2084_s5 }
 0xff1   :  { %1073 = vrot.lane.b32.xlu1 %v1071_v55, %s2075_s30  ;;  %v1151_v9 = vpack.c.bf16 %v1071_v55, %v1071_v55 }
 0xff5   :  { %1153 = vrot.lane.b32.xlu1 %v1151_v9, %s2075_s30 }
0x1062   :  { %v1078_v56 = vpop.permute.xlu0 %1077 }
0x1063   :  { %v1074_v57 = vpop.permute.xlu1 %1073 }
0x1064   :  { %v1080_v58 = vsel %vm110_vm1, %v1074_v57, %v1078_v56 }
0x1065   :  { %v1081_v59 = vpack.c.bf16 %v1080_v58, %v1080_v58 }
0x1067   :  { %v1154_v60 = vpop.permute.xlu1 %1153  ;;  %1806 = vmatmul.mubr.msk.bf16.vlgmr.msra.gmra.mxu1 %vm326_vm2, %v1081_v59 }
0x1068   :  { %1814 = vmatmul.mubr.msk.bf16.vlgmr.msra.gmra.mxu0 %vm110_vm1, %v1154_v60  ;;  %1830 = vmatpush3.bf16.msra.mxu1 %v2145_v2  ;;  %v182_v2 = vadd.f32 %v2247_v43, %v2177_v10 }
0x1069   :  { %1818 = vmatpush3.bf16.msra.mxu0 %v2188_v27  ;;  %1831 = vmatprep.subr.bf16.mxu1 %v2080_v0 }
0x106a   :  { %1819 = vmatprep.subr.bf16.mxu0 %v2080_v0  ;;  %1825 = vmatprep.mubr.msk.bf16.mxu0 %vm2081_vm0, %v2080_v0 }
0x106b   :  { %1833 = vmatprep.mubr.msk.bf16.mxu1 %vm2081_vm0, %v2080_v0 }
0x106c   :  { %1832 = vmatpush3.bf16.msra.mxu1 %v2151_v4 }
0x106d   :  { %1820 = vmatpush3.bf16.msra.mxu0 %v2200_v30  ;;  %1837 = vmatprep.subr.bf16.mxu1 %v2080_v0 }
0x106e   :  { %1821 = vmatprep.subr.bf16.mxu0 %v2080_v0 }
0x1071   :  { %1822 = vmatpush3.bf16.msra.mxu0 %v2211_v31 }
0x1072   :  { %1823 = vmatprep.subr.bf16.mxu0 %v2080_v0 }
0x1075   :  { %1824 = vmatpush3.bf16.msra.mxu0 %v2220_v33 }
0x1127   :  { %v1119_v61 = vpop.f32.mrf.mxu1 }
0x1128   :  { %v1120_v62 = vadd.f32 %v2259_v48, %v1119_v61  ;;  %v1192_v63 = vpop.f32.mrf.mxu0 }
0x1129   :  { %v1198_v4 = vadd.f32 %v1192_v63, %v182_v2  ;;  %v1807_v1 = vpop.f32.mrf.mxu1 }
0x112a   :  { %1967 = vtanh.f32 %v1120_v62  ;;  %v1815_v3 = vpop.f32.mrf.mxu0  ;;  %v1593_v10 = vmul.f32 -1.442695, %v1120_v62 }
0x112b   :  { %1969 = vtanh.f32 %v1198_v4  ;;  %v1122_v5 = vpop.f32.mrf.mxu1  ;;  %v1595_v43 = vmul.f32 -1.442695, %v1198_v4 }
0x112c   :  { %v1195_v6 = vpop.f32.mrf.mxu0  ;;  %1971 = vpow2.f32 %v1593_v10 }
0x112d   :  { %v1808_v8 = vpop.f32.mrf.mxu1  ;;  %1973 = vpow2.f32 %v1595_v43 }
0x112e   :  { %v1816_v11 = vpop.f32.mrf.mxu0 }
0x1137   :  { %v1968_v12 = vpop.eup %1967 }
0x1138   :  { %v1970_v13 = vpop.eup %1969  ;;  %1134 = vrot.lane.b32.xlu0 %v1968_v12, %s2083_s26 }
0x1139   :  { %1208 = vrot.lane.b32.xlu1 %v1970_v13, %s2083_s26  ;;  %v1972_v14 = vpop.eup %1971 }
0x113a   :  { %v1974_v15 = vpop.eup %1973  ;;  %v1128_v16 = vadd.f32 1.0, %v1972_v14 }
0x113b   :  { %v1202_v17 = vadd.f32 1.0, %v1974_v15 }
0x113c   :  { %1975 = vrcp.f32 %v1128_v16 }
0x113d   :  { %1977 = vrcp.f32 %v1202_v17 }
0x1149   :  { %v1976_v19 = vpop.eup %1975 }
0x114a   :  { %v1978_v18 = vpop.eup %1977  ;;  %v1132_v24 = vmul.f32 %v1976_v19, %v2423_v47 }
0x114b   :  { %v1206_v25 = vmul.f32 %v1978_v18, %v2425_v41 }
0x11aa   :  { %v1135_v20 = vpop.permute.xlu0 %1134 }
0x11ab   :  { %v1137_v21 = vmul.f32 %v1976_v19, %v1135_v20  ;;  %v1209_v22 = vpop.permute.xlu1 %1208 }
0x11ac   :  { %v1211_v23 = vmul.f32 %v1978_v18, %v1209_v22 }
0x11ad   :  { %1139 = vrot.lane.b32.xlu0 %v1137_v21, %s2083_s26 }
0x11ae   :  { %1213 = vrot.lane.b32.xlu1 %v1211_v23, %s2083_s26 }
0x121f   :  { %v1140_v46 = vpop.permute.xlu0 %1139 }
0x1220   :  { %v2461_v26 = vadd.f32 %v1140_v46, %v1132_v24  ;;  %v1214_v28 = vpop.permute.xlu1 %1213 }
0x1221   :  { %v2463_v29 = vadd.f32 %v1214_v28, %v1206_v25 }
0x1222   :  { %1979 = vtanh.f32 %v2461_v26 }
0x1223   :  { %1981 = vtanh.f32 %v2463_v29 }
0x122f   :  { %v1980_v32 = vpop.eup %1979 }
0x1230   :  { %v1982_v34 = vpop.eup %1981  ;;  %1145 = vrot.lane.b32.xlu0 %v1980_v32, %s2083_s26 }
0x1231   :  { %1219 = vrot.lane.b32.xlu1 %v1982_v34, %s2083_s26 }
0x12a2   :  { %v1146_v35 = vpop.permute.xlu0 %1145 }
0x12a3   :  { %v1148_v36 = vmul.f32 %v1976_v19, %v1146_v35  ;;  %v1220_v44 = vpop.permute.xlu1 %1219 }
0x12a4   :  { %v1222_v37 = vmul.f32 %v1978_v18, %v1220_v44 }
0x12a5   :  { %1228 = vrot.lane.b32.xlu1 %v1148_v36, %s2084_s5 }
0x12a6   :  { %1224 = vrot.lane.b32.xlu0 %v1222_v37, %s2075_s30  ;;  %v1302_v38 = vpack.c.bf16 %v1222_v37, %v1222_v37  ;;  %v1873_v37 = vld [vmem:[#allocation6 + $0x10] ss:$8 sps:$4 sm:$0xff]  }
0x12aa   :  { %1304 = vrot.lane.b32.xlu0 %v1302_v38, %s2075_s30  ;;  %v1875_v38 = vld [vmem:[#allocation6 + $0x14] ss:$8 sps:$4 sm:$0xff]  }
0x12ab   :  { %1506 = vmatprep.subr.bf16.mxu0 %v1875_v38 }
0x1317   :  { %v1229_v39 = vpop.permute.xlu1 %1228 }
0x1318   :  { %v1225_v40 = vpop.permute.xlu0 %1224 }
0x1319   :  { %v1231_v42 = vsel %vm110_vm1, %v1225_v40, %v1229_v39  ;;  %v1878_v39 = vld [vmem:[#allocation6 + $0x4] ss:$8 sps:$4 sm:$0xff]   ;;  %v1876_v40 = vld [vmem:[#allocation6] ss:$8 sps:$4 sm:$0xff]  }
0x131a   :  { %v1232_v47 = vpack.c.bf16 %v1231_v42, %v1231_v42 }
0x131c   :  { %1826 = vmatmul.mubr.msk.bf16.vlgmr.msra.gmra.mxu0 %vm326_vm2, %v1232_v47  ;;  %v1305_v49 = vpop.permute.xlu0 %1304 }
0x131d   :  { %1834 = vmatmul.mubr.msk.bf16.vlgmr.msra.gmra.mxu1 %vm110_vm1, %v1305_v49  ;;  %1526 = vmatprep.mubr.bf16.mxu0 %v2082_v7  ;;  %v2007_v7 = vld [vmem:[%s2517_s3] ss:$0 sm:$0xff] }
0x131e   :  { %1838 = vmatpush3.bf16.msra.mxu1 %v2188_v27  ;;  %1845 = vmatprep.mubr.msk.bf16.mxu1 %vm2081_vm0, %v2080_v0  ;;  %v185_v27 = vadd.f32 %v2007_v7, %v2251_v45 }
0x131f   :  { %1839 = vmatprep.subr.bf16.mxu1 %v2080_v0  ;;  %1507 = vmatpush1.bf16.msra.mxu0 %v1873_v37 }
0x1320   :  { %1508 = vmatprep.subr.bf16.mxu0 %v1878_v39 }
0x1322   :  { %1840 = vmatpush3.bf16.msra.mxu1 %v2200_v30 }
0x1323   :  { %1841 = vmatprep.subr.bf16.mxu1 %v2080_v0  ;;  %1509 = vmatpush1.bf16.msra.mxu0 %v1876_v40 }
0x1326   :  { %1842 = vmatpush3.bf16.msra.mxu1 %v2211_v31 }
0x1327   :  { %1843 = vmatprep.subr.bf16.mxu1 %v2080_v0 }
0x132a   :  { %1844 = vmatpush3.bf16.msra.mxu1 %v2220_v33 }
0x13dc   :  { %v1270_v41 = vpop.f32.mrf.mxu0 }
0x13dd   :  { %v1271_v50 = vadd.f32 %v2259_v48, %v1270_v41  ;;  %v1343_v51 = vpop.f32.mrf.mxu1  ;;  %v1458_v41 = vlaneseq }
0x13de   :  { %v1349_v52 = vadd.f32 %v1343_v51, %v185_v27  ;;  %v1827_v30 = vpop.f32.mrf.mxu0 }
0x13df   :  { %1983 = vtanh.f32 %v1271_v50  ;;  %v1835_v53 = vpop.f32.mrf.mxu1  ;;  %v1597_v45 = vmul.f32 -1.442695, %v1271_v50  ;;  %v1459_v50 = vshrl.u32 %v1458_v41, 7 }
0x13e0   :  { %1985 = vtanh.f32 %v1349_v52  ;;  %v1273_v31 = vpop.f32.mrf.mxu0  ;;  %v1599_v56 = vmul.f32 -1.442695, %v1349_v52  ;;  %v1456_v52 = vld [vmem:[%s2521_s7] sm:$0x3] }
0x13e1   :  { %v1346_v54 = vpop.f32.mrf.mxu1  ;;  %1987 = vpow2.f32 %v1597_v45  ;;  %v1460_v51 = vsub.s32 0, %v1459_v50  ;;  %v1464_v30 = vsub.s32 1, %v1459_v50 }
0x13e2   :  { %v1828_v0 = vpop.f32.mrf.mxu0  ;;  %1989 = vpow2.f32 %v1599_v56 }
0x13e3   :  { %v1836_v55 = vpop.f32.mrf.mxu1  ;;  %v1461_v53 = vrot.slane %v1456_v52, %v1460_v51  ;;  %v1465_v31 = vrot.slane %v1456_v52, %v1464_v30 }
0x13ec   :  { %v1984_v33 = vpop.eup %1983 }
0x13ed   :  { %v1986_v9 = vpop.eup %1985  ;;  %1285 = vrot.lane.b32.xlu1 %v1984_v33, %s2083_s26 }
0x13ee   :  { %1359 = vrot.lane.b32.xlu0 %v1986_v9, %s2083_s26  ;;  %v1988_v57 = vpop.eup %1987 }
0x13ef   :  { %v1990_v58 = vpop.eup %1989  ;;  %v1279_v59 = vadd.f32 1.0, %v1988_v57 }
0x13f0   :  { %v1353_v60 = vadd.f32 1.0, %v1990_v58 }
0x13f1   :  { %1991 = vrcp.f32 %v1279_v59 }
0x13f2   :  { %1993 = vrcp.f32 %v1353_v60 }
0x13fe   :  { %v1992_v2 = vpop.eup %1991 }
0x13ff   :  { %v1994_v62 = vpop.eup %1993  ;;  %v1283_v3 = vmul.f32 %v1992_v2, %v2461_v26 }
0x1400   :  { %v1357_v6 = vmul.f32 %v1994_v62, %v2463_v29 }
0x145f   :  { %v1286_v61 = vpop.permute.xlu1 %1285 }
0x1460   :  { %v1288_v63 = vmul.f32 %v1992_v2, %v1286_v61  ;;  %v1360_v4 = vpop.permute.xlu0 %1359 }
0x1461   :  { %v1362_v1 = vmul.f32 %v1994_v62, %v1360_v4 }
0x1462   :  { %1290 = vrot.lane.b32.xlu1 %v1288_v63, %s2083_s26 }
0x1463   :  { %1364 = vrot.lane.b32.xlu0 %v1362_v1, %s2083_s26 }
0x14d4   :  { %v1291_v5 = vpop.permute.xlu1 %1290 }
0x14d5   :  { %v1293_v8 = vadd.f32 %v1291_v5, %v1283_v3  ;;  %v1365_v11 = vpop.permute.xlu0 %1364 }
0x14d6   :  { %v1367_v12 = vadd.f32 %v1365_v11, %v1357_v6 }
0x14d7   :  { %1995 = vtanh.f32 %v1293_v8 }
0x14d8   :  { %1997 = vtanh.f32 %v1367_v12 }
0x14e4   :  { %v1996_v13 = vpop.eup %1995 }
0x14e5   :  { %v1998_v10 = vpop.eup %1997  ;;  %1296 = vrot.lane.b32.xlu1 %v1996_v13, %s2083_s26 }
0x14e6   :  { %1370 = vrot.lane.b32.xlu0 %v1998_v10, %s2083_s26 }
0x1557   :  { %v1297_v43 = vpop.permute.xlu1 %1296 }
0x1558   :  { %v1299_v14 = vmul.f32 %v1992_v2, %v1297_v43  ;;  %v1371_v15 = vpop.permute.xlu0 %1370 }
0x1559   :  { %v1373_v16 = vmul.f32 %v1994_v62, %v1371_v15 }
0x155a   :  { %1379 = vrot.lane.b32.xlu0 %v1299_v14, %s2084_s5 }
0x155b   :  { %1375 = vrot.lane.b32.xlu1 %v1373_v16, %s2075_s30 }
0x15cc   :  { %v1380_v17 = vpop.permute.xlu0 %1379 }
0x15cd   :  { %v1376_v19 = vpop.permute.xlu1 %1375 }
0x15ce   :  { %v1382_v20 = vsel %vm110_vm1, %v1376_v19, %v1380_v17 }
0x15cf   :  { %v1383_v18 = vpack.c.bf16 %v1382_v20, %v1382_v20 }
0x15d1   :  { %1846 = vmatmul.mubr.msk.bf16.vlgmr.msra.gmra.mxu1 %vm326_vm2, %v1383_v18 }
0x1691   :  { %v1421_v21 = vpop.f32.mrf.mxu1 }
0x1692   :  { %v1422_v22 = vadd.f32 %v2259_v48, %v1421_v21 }
0x1693   :  { %v1847_v23 = vpop.f32.mrf.mxu1 }
0x1694   :  { %1999 = vtanh.f32 %v1422_v22  ;;  %v1601_v26 = vmul.f32 -1.442695, %v1422_v22 }
0x1695   :  { %v1424_v24 = vpop.f32.mrf.mxu1 }
0x1696   :  { %2001 = vpow2.f32 %v1601_v26 }
0x1697   :  { %v1848_v46 = vpop.f32.mrf.mxu1 }
0x16a1   :  { %v2000_v25 = vpop.eup %1999 }
0x16a2   :  { %1436 = vrot.lane.b32.xlu1 %v2000_v25, %s2083_s26 }
0x16a3   :  { %v2002_v28 = vpop.eup %2001 }
0x16a4   :  { %v1430_v29 = vadd.f32 1.0, %v2002_v28 }
0x16a6   :  { %2003 = vrcp.f32 %v1430_v29 }
0x16b3   :  { %v2004_v32 = vpop.eup %2003 }
0x16b4   :  { %v1434_v36 = vmul.f32 %v2004_v32, %v1293_v8 }
0x1714   :  { %v1437_v34 = vpop.permute.xlu1 %1436 }
0x1715   :  { %v1439_v35 = vmul.f32 %v2004_v32, %v1437_v34 }
0x1717   :  { %1441 = vrot.lane.b32.xlu0 %v1439_v35, %s2083_s26 }
0x1789   :  { %v1442_v44 = vpop.permute.xlu0 %1441 }
0x178a   :  { %v1444_v48 = vadd.f32 %v1442_v44, %v1434_v36 }
0x178c   :  { %2005 = vtanh.f32 %v1444_v48 }
0x1799   :  { %v2006_v42 = vpop.eup %2005 }
0x179a   :  { %1447 = vrot.lane.b32.xlu1 %v2006_v42, %s2083_s26 }
0x180c   :  { %v1448_v47 = vpop.permute.xlu1 %1447 }
0x180d   :  { %v1450_v49 = vmul.f32 %v2004_v32, %v1448_v47 }
0x180f   :  { %v1451_v7 = vpack.c.bf16 %v1450_v49, %v1450_v49 }
0x1811   :  { %1469 = vrot.lane.b32.xlu0 %v1451_v7, %s2075_s30  ;;  %s2048_s30 = scalar_lea.vmem %s1544_s6, 256 }
0x1812   :  { %p2049_p10 = scmp.ne.s32.totalorder %s1544_s6, %s2048_s30  ;;  %p2054_p12 = scmp.lt.s32.totalorder %s2048_s30, %s2048_s30 }
0x1814   :  { %p2055_p13 = por %p2054_p12, %p2053_p11 }
0x1816   :  { %p2056_p0 = pnand %p2055_p13, %p2049_p10 }
0x1883   :  { %v1470_v27 = vpop.permute.xlu0 %1469 }
0x1884   :  { %1606 = vmatmul.mubr.msk.bf16.vlgmr.msra.gmra.mxu0 %vm110_vm1, %v1470_v27 }
0x1944   :  { %v1528_v54 = vpop.f32.mrf.mxu0 }
0x1945   :  { %v1529_v0 = vadd.f32 %v1528_v54, %v1461_v53 }
0x1946   :  { %v1530_v55 = vpop.f32.mrf.mxu0 }
0x1947   :  { %1535 = vst [vmem:[#allocation8] sm:$0xff] %v1529_v0  ;;  %v1531_v33 = vadd.f32 %v1530_v55, %v1465_v31 }
0x1948   :  { %v1532_v9 = vpop.f32.mrf.mxu0 }
0x1949   :  { %1536 = vst [vmem:[#allocation8 + $0x8] sm:$0xff] %v1531_v33 }
0x194a   :  { %v1533_v45 = vpop.f32.mrf.mxu0 }
0x194b   :  { %2059 = shalt.err (!%p2056_p0)
}
0x194c   :  { %1546 = dma.vmem_to_hbm [thread:$0]  %s1544_s6, 256, %s2522_s8, [#allocation5]  }
0x194d   :  { %2072 = dma.done.wait [#allocation5], 256  }
0x194e   :  { %2073 = vsyncadd [#allocation5], 4294967040 }
0x194f   :  { %1550 = vsyncpa [#allocation4], 1 }
0x1950   :  { %1551 = vsyncpa [#allocation7], 1 }
0x1951   :  { %1552 = vsyncpa [#allocation5], 1 }

</bundles_post_ra>
